<compile_context>
chip_gen: v7x
topology: tpu7x:2x2x1
jax: 0.10.0
libtpu: 0.0.40
codegen_flags: <defaults>
</compile_context>

<pallas_src>
import jax
import jax.numpy as jnp
from jax.experimental import pallas as pl
from jax.experimental.pallas import tpu as pltpu

_EPS = 1e-5


def _ds(start, size, stride):
    return pl.ds(start, size, stride) if stride != 1 else pl.ds(start, size)


def _pick_nb(N, per_image_bytes, budget=4 << 20):
    """Largest batch-block size nb that divides N, keeps >= 2 grid steps
    (v7x megacore sharding + double buffering) and respects a VMEM budget."""
    nb = 1
    for cand in range(2, N + 1):
        if N % cand:
            continue
        if cand * per_image_bytes > budget or N // cand < 2:
            break
        nb = cand
    return nb


# ---------- pass 1: conv1 (3x3, stride) fused with the 1x1 projection conv,
# ----------          plus per-step partial BN stats for both branches.
def _make_pass1_kernel(nb, Ho, Wo, Cin, Cout, stride, has_proj):
    def kernel(*refs):
        if has_proj:
            x_ref, w_ref, a1_ref, s_ref, st_ref = refs
        else:
            x_ref, w_ref, a1_ref, st_ref = refs

        # im2col-lite: fold the 3x3 taps into K (= 9*Cin); read the padded
        # input only at the strided output positions; cast each tap to bf16
        # before the concat so the concat/reshape move half the bytes.
        taps = []
        for ky in range(3):
            for kx in range(3):
                t = x_ref[:, _ds(ky, Ho, stride), _ds(kx, Wo, stride), :]
                taps.append(t.astype(jnp.bfloat16))
        xcol = jnp.concatenate(taps, axis=-1).reshape(nb * Ho * Wo, 9 * Cin)

        # Single MXU matmul; with has_proj the weight is (9*Cin, 2*Cout) with
        # wsc embedded at the center-tap rows -> result is [a1 | shortcut].
        ab = jnp.dot(xcol, w_ref[...], preferred_element_type=jnp.float32)

        st_ref[...] = jnp.concatenate(
            [jnp.sum(ab, axis=0, keepdims=True),
             jnp.sum(ab * ab, axis=0, keepdims=True)], axis=0)

        if has_proj:
            a1 = ab[:, :Cout]
            s = ab[:, Cout:]
            s_ref[...] = s.reshape(nb, Ho, Wo, Cout).astype(s_ref.dtype)
        else:
            a1 = ab
        a1_ref[...] = a1.reshape(nb, Ho, Wo, Cout).astype(a1_ref.dtype)

    return kernel


# ---------- pass 2: BN1 (fused scale/shift) + ReLU + conv2 (3x3) + partial stats
def _make_pass2_kernel(nb, Ho, Wo, Cout):
    def kernel(a1_ref, sc1_ref, sh1_ref, w2_ref, a2_ref, st2_ref, ypad_ref):
        sc1 = sc1_ref[...].reshape(1, 1, 1, Cout)
        sh1 = sh1_ref[...].reshape(1, 1, 1, Cout)
        y1 = jnp.maximum(a1_ref[...].astype(jnp.float32) * sc1 + sh1, 0.0)

        # Zero only the 1-pixel halo of the bf16 scratch (interior is fully
        # overwritten).  Kept per-step for multi-core (v7x) correctness: the
        # scratch is per-TensorCore and only one core sees program_id == 0.
        zrow = jnp.zeros((nb, 1, Wo + 2, Cout), ypad_ref.dtype)
        zcol = jnp.zeros((nb, Ho + 2, 1, Cout), ypad_ref.dtype)
        ypad_ref[:, 0:1, :, :] = zrow
        ypad_ref[:, Ho + 1:Ho + 2, :, :] = zrow
        ypad_ref[:, :, 0:1, :] = zcol
        ypad_ref[:, :, Wo + 1:Wo + 2, :] = zcol
        ypad_ref[:, 1:Ho + 1, 1:Wo + 1, :] = y1.astype(ypad_ref.dtype)

        taps = []
        for ky in range(3):
            for kx in range(3):
                taps.append(ypad_ref[:, ky:ky + Ho, kx:kx + Wo, :])
        ycol = jnp.concatenate(taps, axis=-1).reshape(nb * Ho * Wo, 9 * Cout)
        a2 = jnp.dot(ycol, w2_ref[...], preferred_element_type=jnp.float32)

        st2_ref[...] = jnp.concatenate(
            [jnp.sum(a2, axis=0, keepdims=True),
             jnp.sum(a2 * a2, axis=0, keepdims=True)], axis=0)
        a2_ref[...] = a2.reshape(nb, Ho, Wo, Cout).astype(a2_ref.dtype)

    return kernel


# ---------- pass 3: BN2 + shortcut BN (or identity) + add + ReLU,
# ----------          lane-dense flat layout (nb, Ho, Wo*Cout), no reshapes.
def _make_pass3_kernel(has_proj):
    def kernel(*refs):
        if has_proj:
            a2_ref, sc2_ref, sh2_ref, s_ref, scs_ref, shs_ref, o_ref = refs
            scs = scs_ref[...].reshape(1, 1, -1)
            shs = shs_ref[...].reshape(1, 1, -1)
            shortcut = s_ref[...].astype(jnp.float32) * scs + shs
        else:
            a2_ref, sc2_ref, sh2_ref, s_ref, o_ref = refs
            shortcut = s_ref[...].astype(jnp.float32)
        sc2 = sc2_ref[...].reshape(1, 1, -1)
        sh2 = sh2_ref[...].reshape(1, 1, -1)
        o_ref[...] = jnp.maximum(
            a2_ref[...].astype(jnp.float32) * sc2 + sh2 + shortcut, 0.0)

    return kernel


def _bn_scale_shift(stat, gamma, beta, count):
    """Finalize training-mode BN from per-step (sum, sumsq) partials."""
    tot = jnp.sum(stat.astype(jnp.float32), axis=0)        # (2, C)
    mean = tot[0] / count
    var = tot[1] / count - mean * mean                      # biased variance
    var = jnp.maximum(var, 0.0)                             # guard cancellation
    # TODO(synk): switch to per-step-centered / Welford partials if batch
    # sizes grow enough for E[x^2]-E[x]^2 to cancel catastrophically.
    rstd = jax.lax.rsqrt(var + _EPS)
    scale = gamma.reshape(-1) * rstd
    shift = beta.reshape(-1) - mean * scale
    return scale.reshape(1, -1), shift.reshape(1, -1)


def residual_block(x_nchw, params, stride=1):
    """Pallas implementation of ResidualBlock.forward (input/output in NCHW)."""
    x = jnp.transpose(x_nchw, (0, 2, 3, 1)).astype(jnp.float32)   # NCHW -> NHWC
    N, H, W, Cin = x.shape
    Cout = params["w1"].shape[-1]
    has_proj = (stride != 1) or (Cin != Cout)
    Ho = (H - 1) // stride + 1
    Wo = (W - 1) // stride + 1
    count = N * Ho * Wo
    Cw = 2 * Cout if has_proj else Cout

    # bf16 HBM input when the tap reads are unstrided; the strided case keeps
    # 32-bit ref reads (taps are cast to bf16 per-tap inside the kernel).
    x_dtype = jnp.bfloat16 if stride == 1 else jnp.float32
    xpad = jnp.pad(x.astype(x_dtype), ((0, 0), (1, 1), (1, 1), (0, 0)))
    # TODO(synk): drop the wrapper-side pad (DMA into a zero-haloed scratch)
    # and row-tile H with a 1-row halo for real ResNet shapes on v7x (64 MiB VMEM).

    w1col = params["w1"].reshape(9 * Cin, Cout)
    if has_proj:
        # Fuse the 1x1/stride-s projection into the conv1 matmul: it is exactly
        # the center (1,1) tap of the padded 3x3 read, so embed wsc at that row
        # block and concatenate along the output axis.
        wsc_emb = jnp.zeros((9 * Cin, Cout), jnp.float32)
        wsc_emb = wsc_emb.at[4 * Cin:5 * Cin, :].set(params["wsc"])
        wcomb = jnp.concatenate([w1col, wsc_emb], axis=-1).astype(jnp.bfloat16)
    else:
        wcomb = w1col.astype(jnp.bfloat16)
    w2col = params["w2"].reshape(9 * Cout, Cout).astype(jnp.bfloat16)

    # Rough per-image VMEM footprint (input block + im2col + scratch + outputs).
    per_image = ((H + 2) * (W + 2) * Cin * 4
                 + Ho * Wo * 9 * max(Cin, Cout) * 6
                 + (Ho + 2) * (Wo + 2) * Cout * 2
                 + 6 * Ho * Wo * Cout * 4)
    nb = _pick_nb(N, per_image)
    G = N // nb

    par = pltpu.CompilerParams(dimension_semantics=("parallel",),
                               vmem_limit_bytes=32 * 1024 * 1024)

    def img4(hh, ww, cc):
        return pl.BlockSpec((nb, hh, ww, cc), lambda n: (n, 0, 0, 0))

    def flat3(hh, ll):
        return pl.BlockSpec((nb, hh, ll), lambda n: (n, 0, 0))

    def full2(a, b):
        return pl.BlockSpec((a, b), lambda n: (0, 0))

    def stat_spec(c):
        return pl.BlockSpec((None, 2, c), lambda n: (n, 0, 0))

    # ---- pass 1: conv1 (+ fused projection) and per-step BN partial stats ----
    k1 = _make_pass1_kernel(nb, Ho, Wo, Cin, Cout, stride, has_proj)
    out_shape = [jax.ShapeDtypeStruct((N, Ho, Wo, Cout), jnp.bfloat16)]
    out_specs = [img4(Ho, Wo, Cout)]
    if has_proj:
        out_shape.append(jax.ShapeDtypeStruct((N, Ho, Wo, Cout), jnp.bfloat16))
        out_specs.append(img4(Ho, Wo, Cout))
    out_shape.append(jax.ShapeDtypeStruct((G, 2, Cw), jnp.float32))
    out_specs.append(stat_spec(Cw))
    outs = pl.pallas_call(
        k1, grid=(G,),
        in_specs=[img4(H + 2, W + 2, Cin), full2(9 * Cin, Cw)],
        out_specs=out_specs, out_shape=tuple(out_shape),
        compiler_params=par)(xpad, wcomb)
    if has_proj:
        a1, s_raw, st1c = outs
        st1, stsc = st1c[:, :, :Cout], st1c[:, :, Cout:]
    else:
        a1, st1 = outs

    # ---- pass 2: BN1 + ReLU + conv2 and per-step BN2 partial stats ----
    scale1, shift1 = _bn_scale_shift(st1, params["g1"], params["b1"], count)
    k2 = _make_pass2_kernel(nb, Ho, Wo, Cout)
    a2, st2 = pl.pallas_call(
        k2, grid=(G,),
        in_specs=[img4(Ho, Wo, Cout), full2(1, Cout), full2(1, Cout),
                  full2(9 * Cout, Cout)],
        out_specs=[img4(Ho, Wo, Cout), stat_spec(Cout)],
        out_shape=(jax.ShapeDtypeStruct((N, Ho, Wo, Cout), jnp.bfloat16),
                   jax.ShapeDtypeStruct((G, 2, Cout), jnp.float32)),
        scratch_shapes=[pltpu.VMEM((nb, Ho + 2, Wo + 2, Cout), jnp.bfloat16)],
        compiler_params=par,
    )(a1, scale1, shift1, w2col)

    # ---- pass 3: BN2 + shortcut BN (or identity) + add + ReLU --------------
    # Lane-dense flat layout: re-viewing (N,Ho,Wo,Cout) as (N,Ho,Wo*Cout) is a
    # free wrapper-side reshape (same HBM layout); scale/shift are pre-tiled
    # to (1, Wo*Cout) so the kernel is pure FMA with wide unmasked stores.
    scale2, shift2 = _bn_scale_shift(st2, params["g2"], params["b2"], count)
    L = Wo * Cout
    a2_flat = a2.reshape(N, Ho, L)
    sc2w = jnp.tile(scale2, (1, Wo))
    sh2w = jnp.tile(shift2, (1, Wo))
    k3 = _make_pass3_kernel(has_proj)
    in_specs = [flat3(Ho, L), full2(1, L), full2(1, L)]
    if has_proj:
        scale_sc, shift_sc = _bn_scale_shift(stsc, params["gsc"],
                                             params["bsc"], count)
        args = [a2_flat, sc2w, sh2w, s_raw.reshape(N, Ho, L),
                jnp.tile(scale_sc, (1, Wo)), jnp.tile(shift_sc, (1, Wo))]
        in_specs += [flat3(Ho, L), full2(1, L), full2(1, L)]
    else:
        # Identity shortcut kept in f32 to preserve residual precision.
        args = [a2_flat, sc2w, sh2w, x.reshape(N, H, W * Cin)]
        in_specs += [flat3(H, W * Cin)]
    out = pl.pallas_call(
        k3, grid=(G,), in_specs=in_specs,
        out_specs=flat3(Ho, L),
        out_shape=jax.ShapeDtypeStruct((N, Ho, L), jnp.float32),
        compiler_params=par,
    )(*args)

    return jnp.transpose(out.reshape(N, Ho, Wo, Cout), (0, 3, 1, 2))  # -> NCHW


def reference(x_nchw, params, stride=1):
    """Pure-JAX reference (lax.conv, f32 highest precision)."""
    x = jnp.transpose(x_nchw, (0, 2, 3, 1)).astype(jnp.float32)
    hi = jax.lax.Precision.HIGHEST

    def conv(v, w, s, pad):
        return jax.lax.conv_general_dilated(
            v, w, (s, s), [(pad, pad), (pad, pad)],
            dimension_numbers=("NHWC", "HWIO", "NHWC"), precision=hi)

    def bn(v, g, b):
        mu = v.mean((0, 1, 2), keepdims=True)
        var = ((v - mu) ** 2).mean((0, 1, 2), keepdims=True)
        return (v - mu) * jax.lax.rsqrt(var + _EPS) * g.reshape(1, 1, 1, -1) \
            + b.reshape(1, 1, 1, -1)

    Cin = x.shape[-1]
    Cout = params["w1"].shape[-1]
    y = jax.nn.relu(bn(conv(x, params["w1"], stride, 1), params["g1"], params["b1"]))
    y = bn(conv(y, params["w2"], 1, 1), params["g2"], params["b2"])
    if stride != 1 or Cin != Cout:
        wsc = params["wsc"].reshape(1, 1, Cin, Cout)
        sc = bn(conv(x, wsc, stride, 0), params["gsc"], params["bsc"])  # 1x1: no pad
    else:
        sc = x
    return jnp.transpose(jax.nn.relu(y + sc), (0, 3, 1, 2))


def _make_params(key, Cin, Cout, has_proj):
    ks = jax.random.split(key, 9)
    p = {
        "w1": 0.1 * jax.random.normal(ks[0], (3, 3, Cin, Cout), jnp.float32),
        "g1": 1.0 + 0.1 * jax.random.normal(ks[1], (1, Cout), jnp.float32),
        "b1": 0.1 * jax.random.normal(ks[2], (1, Cout), jnp.float32),
        "w2": 0.1 * jax.random.normal(ks[3], (3, 3, Cout, Cout), jnp.float32),
        "g2": 1.0 + 0.1 * jax.random.normal(ks[4], (1, Cout), jnp.float32),
        "b2": 0.1 * jax.random.normal(ks[5], (1, Cout), jnp.float32),
    }
    if has_proj:
        p["wsc"] = 0.1 * jax.random.normal(ks[6], (Cin, Cout), jnp.float32)
        p["gsc"] = 1.0 + 0.1 * jax.random.normal(ks[7], (1, Cout), jnp.float32)
        p["bsc"] = 0.1 * jax.random.normal(ks[8], (1, Cout), jnp.float32)
    return p


if __name__ == "__main__":
    key = jax.random.PRNGKey(0)
    configs = [
        # (N, Cin, Cout, H, W, stride)
        (2, 4, 8, 16, 16, 1),   # projection shortcut (channel change)
        (2, 4, 8, 16, 16, 2),   # projection shortcut (stride 2)
        (2, 8, 8, 16, 16, 1),   # identity shortcut
    ]
    for cfg_i, (N, Cin, Cout, H, W, stride) in enumerate(configs):
        kp, kx = jax.random.split(jax.random.fold_in(key, cfg_i))
        has_proj = (stride != 1) or (Cin != Cout)
        params = _make_params(kp, Cin, Cout, has_proj)
        x = jax.random.normal(kx, (N, Cin, H, W), jnp.float32)

        out = jax.block_until_ready(residual_block(x, params, stride=stride))
        Ho = (H - 1) // stride + 1
        Wo = (W - 1) // stride + 1
        assert out.shape == (N, Cout, Ho, Wo), out.shape

        ref = jax.block_until_ready(reference(x, params, stride=stride))
        err = float(jnp.max(jnp.abs(out - ref)))
        # bf16 MXU operands and bf16-stored intermediates vs. a HIGHEST-precision
        # f32 reference -> loose tolerance.
        assert err < 7.5e-2, f"config {cfg_i}: kernel/reference mismatch, max abs err = {err}"

    print("KERNEL_OK")
</pallas_src>

<mosaic_0001>
module attributes {stable_mosaic.version = 11 : i64} {
  func.func @kernel(%arg0: i32, %arg1: memref<1x18x18x4xbf16, #tpu.memory_space<vmem>>, %arg2: memref<36x16xbf16, #tpu.memory_space<vmem>>, %arg3: memref<1x16x16x8xbf16, #tpu.memory_space<vmem>>, %arg4: memref<1x16x16x8xbf16, #tpu.memory_space<vmem>>, %arg5: memref<1x2x16xf32, #tpu.memory_space<vmem>>) attributes {dimension_semantics = [#tpu.dimension_semantics<parallel>], iteration_bounds = array<i64: 2>, scalar_prefetch = 0 : i64, scratch_operands = 0 : i64, tpu.core_type = #tpu.core_type<tc>, window_params = [{transform_indices = @transform_0, window_bounds = array<i64: 1, 18, 18, 4>}, {pipeline_mode = #tpu.pipeline_mode<synchronous>, transform_indices = @transform_1, window_bounds = array<i64: 36, 16>}, {transform_indices = @transform_2, window_bounds = array<i64: 1, 16, 16, 8>}, {transform_indices = @transform_3, window_bounds = array<i64: 1, 16, 16, 8>}, {transform_indices = @transform_4, window_bounds = array<i64: 1, 2, 16>}]} {
    %c0 = arith.constant 0 : index
    %c0_0 = arith.constant 0 : index
    %c0_1 = arith.constant 0 : index
    %c0_2 = arith.constant 0 : index
    %0 = vector.load %arg1[%c0, %c0_0, %c0_1, %c0_2] : memref<1x18x18x4xbf16, #tpu.memory_space<vmem>>, vector<1x16x16x4xbf16>
    %c0_3 = arith.constant 0 : index
    %c0_4 = arith.constant 0 : index
    %c1 = arith.constant 1 : index
    %c0_5 = arith.constant 0 : index
    %1 = vector.load %arg1[%c0_3, %c0_4, %c1, %c0_5] : memref<1x18x18x4xbf16, #tpu.memory_space<vmem>>, vector<1x16x16x4xbf16>
    %c0_6 = arith.constant 0 : index
    %c0_7 = arith.constant 0 : index
    %c2 = arith.constant 2 : index
    %c0_8 = arith.constant 0 : index
    %2 = vector.load %arg1[%c0_6, %c0_7, %c2, %c0_8] : memref<1x18x18x4xbf16, #tpu.memory_space<vmem>>, vector<1x16x16x4xbf16>
    %c0_9 = arith.constant 0 : index
    %c1_10 = arith.constant 1 : index
    %c0_11 = arith.constant 0 : index
    %c0_12 = arith.constant 0 : index
    %3 = vector.load %arg1[%c0_9, %c1_10, %c0_11, %c0_12] : memref<1x18x18x4xbf16, #tpu.memory_space<vmem>>, vector<1x16x16x4xbf16>
    %c0_13 = arith.constant 0 : index
    %c1_14 = arith.constant 1 : index
    %c1_15 = arith.constant 1 : index
    %c0_16 = arith.constant 0 : index
    %4 = vector.load %arg1[%c0_13, %c1_14, %c1_15, %c0_16] : memref<1x18x18x4xbf16, #tpu.memory_space<vmem>>, vector<1x16x16x4xbf16>
    %c0_17 = arith.constant 0 : index
    %c1_18 = arith.constant 1 : index
    %c2_19 = arith.constant 2 : index
    %c0_20 = arith.constant 0 : index
    %5 = vector.load %arg1[%c0_17, %c1_18, %c2_19, %c0_20] : memref<1x18x18x4xbf16, #tpu.memory_space<vmem>>, vector<1x16x16x4xbf16>
    %c0_21 = arith.constant 0 : index
    %c2_22 = arith.constant 2 : index
    %c0_23 = arith.constant 0 : index
    %c0_24 = arith.constant 0 : index
    %6 = vector.load %arg1[%c0_21, %c2_22, %c0_23, %c0_24] : memref<1x18x18x4xbf16, #tpu.memory_space<vmem>>, vector<1x16x16x4xbf16>
    %c0_25 = arith.constant 0 : index
    %c2_26 = arith.constant 2 : index
    %c1_27 = arith.constant 1 : index
    %c0_28 = arith.constant 0 : index
    %7 = vector.load %arg1[%c0_25, %c2_26, %c1_27, %c0_28] : memref<1x18x18x4xbf16, #tpu.memory_space<vmem>>, vector<1x16x16x4xbf16>
    %c0_29 = arith.constant 0 : index
    %c2_30 = arith.constant 2 : index
    %c2_31 = arith.constant 2 : index
    %c0_32 = arith.constant 0 : index
    %8 = vector.load %arg1[%c0_29, %c2_30, %c2_31, %c0_32] : memref<1x18x18x4xbf16, #tpu.memory_space<vmem>>, vector<1x16x16x4xbf16>
    %9 = tpu.concatenate %0, %1, %2, %3, %4, %5, %6, %7, %8 in 3 : vector<1x16x16x4xbf16>, vector<1x16x16x4xbf16>, vector<1x16x16x4xbf16>, vector<1x16x16x4xbf16>, vector<1x16x16x4xbf16>, vector<1x16x16x4xbf16>, vector<1x16x16x4xbf16>, vector<1x16x16x4xbf16>, vector<1x16x16x4xbf16> -> vector<1x16x16x36xbf16>
    %10 = vector.shape_cast %9 : vector<1x16x16x36xbf16> to vector<256x36xbf16>
    %c0_33 = arith.constant 0 : index
    %c0_34 = arith.constant 0 : index
    %11 = vector.load %arg2[%c0_33, %c0_34] : memref<36x16xbf16, #tpu.memory_space<vmem>>, vector<36x16xbf16>
    %cst = arith.constant dense<0.000000e+00> : vector<256x16xf32>
    %12 = tpu.matmul %10, %11, %cst {dimension_numbers = #tpu.dot_dimension_numbers<[1], [0], [0], [1], [0, 0, 1, 1], [], []>} : vector<256x36xbf16>, vector<36x16xbf16>, vector<256x16xf32> -> vector<256x16xf32>
    %cst_35 = arith.constant dense<0.000000e+00> : vector<16xf32>
    %13 = vector.multi_reduction <add>, %12, %cst_35 [0] : vector<256x16xf32> to vector<16xf32>
    %14 = vector.shape_cast %13 : vector<16xf32> to vector<1x16xf32>
    %15 = arith.mulf %12, %12 : vector<256x16xf32>
    %cst_36 = arith.constant dense<0.000000e+00> : vector<16xf32>
    %16 = vector.multi_reduction <add>, %15, %cst_36 [0] : vector<256x16xf32> to vector<16xf32>
    %17 = vector.shape_cast %16 : vector<16xf32> to vector<1x16xf32>
    %18 = tpu.concatenate %14, %17 in 0 : vector<1x16xf32>, vector<1x16xf32> -> vector<2x16xf32>
    %c0_37 = arith.constant 0 : index
    %c0_38 = arith.constant 0 : index
    %c0_39 = arith.constant 0 : index
    %19 = vector.load %arg5[%c0_37, %c0_38, %c0_39] : memref<1x2x16xf32, #tpu.memory_space<vmem>>, vector<1x2x16xf32>
    %20 = vector.shape_cast %19 : vector<1x2x16xf32> to vector<2x16xf32>
    %21 = vector.shape_cast %18 : vector<2x16xf32> to vector<1x2x16xf32>
    tpu.vector_store %arg5[%c0_37, %c0_38, %c0_39], %21 {strides = array<i32>} : memref<1x2x16xf32, #tpu.memory_space<vmem>>, vector<1x2x16xf32>,
    %22 = vector.extract_strided_slice %12 {offsets = [0, 0], sizes = [256, 8], strides = [1, 1]} : vector<256x16xf32> to vector<256x8xf32>
    %23 = vector.extract_strided_slice %12 {offsets = [0, 8], sizes = [256, 8], strides = [1, 1]} : vector<256x16xf32> to vector<256x8xf32>
    %24 = vector.shape_cast %23 : vector<256x8xf32> to vector<1x16x16x8xf32>
    %25 = arith.truncf %24 : vector<1x16x16x8xf32> to vector<1x16x16x8xbf16>
    %c0_40 = arith.constant 0 : index
    %c0_41 = arith.constant 0 : index
    %c0_42 = arith.constant 0 : index
    %c0_43 = arith.constant 0 : index
    %26 = vector.load %arg4[%c0_40, %c0_41, %c0_42, %c0_43] : memref<1x16x16x8xbf16, #tpu.memory_space<vmem>>, vector<1x16x16x8xbf16>
    tpu.vector_store %arg4[%c0_40, %c0_41, %c0_42, %c0_43], %25 {strides = array<i32>} : memref<1x16x16x8xbf16, #tpu.memory_space<vmem>>, vector<1x16x16x8xbf16>,
    %27 = vector.shape_cast %22 : vector<256x8xf32> to vector<1x16x16x8xf32>
    %28 = arith.truncf %27 : vector<1x16x16x8xf32> to vector<1x16x16x8xbf16>
    %c0_44 = arith.constant 0 : index
    %c0_45 = arith.constant 0 : index
    %c0_46 = arith.constant 0 : index
    %c0_47 = arith.constant 0 : index
    %29 = vector.load %arg3[%c0_44, %c0_45, %c0_46, %c0_47] : memref<1x16x16x8xbf16, #tpu.memory_space<vmem>>, vector<1x16x16x8xbf16>
    tpu.vector_store %arg3[%c0_44, %c0_45, %c0_46, %c0_47], %28 {strides = array<i32>} : memref<1x16x16x8xbf16, #tpu.memory_space<vmem>>, vector<1x16x16x8xbf16>,
    return
  }
  func.func @transform_0(%arg0: i32) -> (i32, i32, i32, i32) {
    %c0_i32 = arith.constant 0 : i32
    %c0_i32_0 = arith.constant 0 : i32
    %c0_i32_1 = arith.constant 0 : i32
    %c0_i32_2 = arith.constant 0 : i32
    return %arg0, %c0_i32, %c0_i32_0, %c0_i32_1 : i32, i32, i32, i32
  }
  func.func @transform_1(%arg0: i32) -> (i32, i32) {
    %c0_i32 = arith.constant 0 : i32
    %c0_i32_0 = arith.constant 0 : i32
    %c0_i32_1 = arith.constant 0 : i32
    return %c0_i32, %c0_i32_0 : i32, i32
  }
  func.func @transform_2(%arg0: i32) -> (i32, i32, i32, i32) {
    %c0_i32 = arith.constant 0 : i32
    %c0_i32_0 = arith.constant 0 : i32
    %c0_i32_1 = arith.constant 0 : i32
    %c0_i32_2 = arith.constant 0 : i32
    return %arg0, %c0_i32, %c0_i32_0, %c0_i32_1 : i32, i32, i32, i32
  }
  func.func @transform_3(%arg0: i32) -> (i32, i32, i32, i32) {
    %c0_i32 = arith.constant 0 : i32
    %c0_i32_0 = arith.constant 0 : i32
    %c0_i32_1 = arith.constant 0 : i32
    %c0_i32_2 = arith.constant 0 : i32
    return %arg0, %c0_i32, %c0_i32_0, %c0_i32_1 : i32, i32, i32, i32
  }
  func.func @transform_4(%arg0: i32) -> (i32, i32, i32) {
    %c0_i32 = arith.constant 0 : i32
    %c0_i32_0 = arith.constant 0 : i32
    %c0_i32_1 = arith.constant 0 : i32
    return %arg0, %c0_i32, %c0_i32_0 : i32, i32, i32
  }
}

</mosaic_0001>

<bundles_post_ra>
// kernel: tpu_custom_call.1
= control target key start
LH: loop header
LB: loop body
LE: loop exit
PB: predicated region body
PF: predicated region fallthrough
CT: control target
= control target key end

     0   :  { %10 = vsyncpa [#allocation3], 0  ;;  %s5404_s0 = inlined_call_operand.vmem [shape: bf16[2,18,18,4], index: 0, kind: input, shape index: {}]   ;;  %s5405_s1 = inlined_call_operand.vmem [shape: bf16[36,16], index: 1, kind: input, shape index: {}]   ;;  %s5406_s2 = inlined_call_operand.vmem [shape: bf16[2,16,16,8], index: 2, kind: output, shape index: {0}]   ;;  %s5407_s3 = inlined_call_operand.vmem [shape: bf16[2,16,16,8], index: 3, kind: output, shape index: {1}]   ;;  %s5408_s4 = inlined_call_operand.hbm [shape: f32[2,2,16], index: 4, kind: output, shape index: {2}]  }
   0x1   :  { %12 = vsyncpa [#allocation3 + $0x1], 0  ;;  %s3737_s15 = smov 0   ;;  %s3739_s16 = smov 0  }
   0x2   :  { %s3741_s17 = smov 0   ;;  %s3743_s18 = smov 0  }
   0x3 LB: > { %s3758_s19 = sadd.s32 4294967295, %s3700_s18   ;;  %s3006_s20 = sadd.s32 4294967294, %s3700_s18   ;;  %s3700_s18 = sphi %s3743_s18, %s5426_s18   ;;  %s3696_s17 = sphi %s3741_s17, %s5425_s17   ;;  %s3692_s16 = sphi %s3739_s16, %s5424_s16   ;;  %s3688_s15 = sphi %s3737_s15, %s5423_s15  }
   0x4   : > { %s3762_s21 = sadd.s32 1, %s3700_s18   ;;  %s124_s22 = sadd.s32 1, %s3696_s17 }
   0x5   : > { %s121_s23 = ssub.s32 %s3700_s18, %s3762_s21  ;;  %p134_p0 = scmp.ne.s32.totalorder %s3696_s17, %s3692_s16 }
   0x6   : > { %p122_p1 = scmp.eq.s32.totalorder %s121_s23, 0  ;;  %p135_p2 = scmp.eq.s32.totalorder %s3758_s19, 1 }
   0x7   : > { %p140_p3 = scmp.ne.s32.totalorder %s3692_s16, %s3688_s15  ;;  %p141_p4 = scmp.eq.s32.totalorder %s3006_s20, 1 }
   0x8   : > { %s3773_s24 = scalar_select %p122_p1, %s3696_s17, %s124_s22  }
   0x9   : > { %p3775_p5 = por %p135_p2, %p134_p0  ;;  %p3779_p6 = por %p141_p4, %p140_p3 }
   0xa   : > { %p3009_p7 = scmp.ge.s32.totalorder %s3700_s18, 1  ;;  %p170_p8 = scmp.lt.s32.totalorder %s3700_s18, 3 }
   0xc   : > { %p171_p9 = pnand %p3009_p7, %p170_p8 }
   0xe   : > { %174 = sbr.rel (%p171_p9) target bundleno = 746 (0x2ea), region = 28 }
  0x15   : > { %p206_p10 = scmp.lt.s32.totalorder %s3758_s19, 1  ;;  %s3702_s6 = smov 12   ;;  %vm817_vm0 = vcmask 1046528   ;;  %vm544_vm1 = vsmask.f32 7424  ;;  %vm2239_vm2 = vcmask 1041408  }
  0x16   : > { %s3703_s7 = smov 8   ;;  %s3704_s8 = smov 4   ;;  %vm1922_vm3 = vcmask 31744   ;;  %vm1955_vm4 = vcmask 64512   ;;  %vm1988_vm5 = vcmask 97280   ;;  %vm2021_vm6 = vcmask 130048  }
  0x17   : > { %s3787_s27 = scalar_select %p206_p10, %s3758_s19, 1  ;;  %vm2054_vm7 = vcmask 162816   ;;  %vm2087_vm8 = vcmask 195584   ;;  %vm2120_vm9 = vcmask 228352   ;;  %vm2153_vm10 = vcmask 261120  }
  0x18   : > { %s3705_s9 = smov 16   ;;  %s3706_s10 = smov 20   ;;  %vm2206_vm11 = vcmask 293888   ;;  %vm2770_vm12 = vcmask 60416   ;;  %vm2574_vm13 = vcmask 1040384   ;;  %vm2576_vm14 = vcmask 123904  }
  0x19   : > { %s3442_s28 = smul.u32 216, %s3787_s27  ;;  %s3707_s13 = smov 24  }
  0x1a   : > { %s3708_s22 = smov 28   ;;  %s3709_s23 = smov 32  }
  0x1b   : > { %s3793_s5 = scalar_lea.vmem %s5404_s0, %s3442_s28  ;;  %s3343_s30 = sshll.u32 %s3787_s27, 7 }
  0x1c   : > { %v3032_v0 = vld [vmem:[%s3793_s5 + $0x6c] sm:$0xf]  ;;  %v3797_v1 = vld [vmem:[%s3793_s5 + $0x70] sm:$0xf]  ;;  %v239_v6 = vld [vmem:[%s3793_s5 + $0x64] sm:$0xf]  ;;  %s5111_s11 = scalar_lea.vmem %s5407_s3, %s3343_s30 }
  0x1d   : > { %v3800_v2 = vcombine.low %v3032_v0, %v3797_v1  ;;  %v3016_v3 = vld [vmem:[%s3793_s5 + $0xc] sm:$0xf]  ;;  %v3804_v4 = vld [vmem:[%s3793_s5 + $0x10] sm:$0xf]  ;;  %v278_v7 = vld [vmem:[%s3793_s5 + $0x60] sm:$0xe] }
  0x1e   : > { %v3807_v5 = vcombine.low %v3016_v3, %v3804_v4  ;;  %v3814_v8 = vld [vmem:[%s3793_s5 + $0x68] ss:$0 sps:$4 sm:$0x11]   ;;  %v3184_v9 = vcombine.low %v278_v7, %v239_v6  ;;  %v238_v10 = vld [vmem:[%s3793_s5 + $0x60] sm:$0xf]  ;;  %s203_s27 = sand.u32 1, %s3692_s16  }
  0x1f   : > { %994 = vrot.lane.b32.xlu1 %v3800_v2, %s3702_s6  ;;  %v1157_v11 = vshll.u32 %v3800_v2, 16  ;;  %v223_v12 = vld [vmem:[%s3793_s5 + $0x4] sm:$0xf]  ;;  %v843_v14 = vrot.slane %v3814_v8, 1  ;;  %v270_v15 = vld [vmem:[%s3793_s5] sm:$0xe]  ;;  %v3825_v18 = vcombine.low %v238_v10, %v239_v6 }
  0x20   : > { %978 = vrot.lane.b32.xlu0 %v3807_v5, %s3702_s6  ;;  %v842_v13 = vrot.slane %v3184_v9, 1  ;;  %v222_v16 = vld [vmem:[%s3793_s5] sm:$0xf]  ;;  %v1061_v17 = vshll.u32 %v3807_v5, 16  ;;  %v3176_v20 = vcombine.low %v270_v15, %v223_v12  ;;  %v240_v21 = vld [vmem:[%s3793_s5 + $0x6c] sm:$0xf] }
  0x21   : > { %v3498_v19 = vld [vmem:[%s3793_s5 + $0x8] ss:$0 sps:$4 sm:$0x11]   ;;  %v3830_v23 = vcombine.low %v222_v16, %v223_v12  ;;  %v241_v24 = vld [vmem:[%s3793_s5 + $0x70] sm:$0xf]  ;;  %v642_v30 = vshrl.u32 %v3825_v18, 16 }
  0x22   : > { %v844_v22 = vsel %vm817_vm0, %v842_v13, %v843_v14  ;;  %v279_v25 = vld [vmem:[%s3793_s5 + $0x6c] sm:$0xe]  ;;  %v818_v26 = vrot.slane %v3176_v20, 1  ;;  %v819_v27 = vrot.slane %v3498_v19, 1  ;;  %v3837_v31 = vcombine.low %v240_v21, %v241_v24  ;;  %v225_v33 = vld [vmem:[%s3793_s5 + $0x10] sm:$0xf] }
  0x23   : > { %882 = vrot.lane.b32.xlu1 %v844_v22, %s3703_s7  ;;  %v3502_v28 = vld [vmem:[%s3793_s5 + $0x74] ss:$0 sps:$4 sm:$0x11]   ;;  %v3185_v29 = vcombine.low %v279_v25, %v241_v24  ;;  %v224_v32 = vld [vmem:[%s3793_s5 + $0xc] sm:$0xf]  ;;  %v546_v41 = vshrl.u32 %v3830_v23, 16 }
  0x24   : > { %v820_v34 = vsel %vm817_vm0, %v818_v26, %v819_v27  ;;  %v846_v36 = vrot.slane %v3502_v28, 1  ;;  %v271_v37 = vld [vmem:[%s3793_s5 + $0xc] sm:$0xe]  ;;  %v3843_v38 = vcombine.low %v224_v32, %v225_v33  ;;  %v3505_v39 = vld [vmem:[%s3793_s5 + $0x14] ss:$0 sps:$4 sm:$0x11]  }
  0x25   : > { %v845_v35 = vrot.slane %v3185_v29, 1  ;;  %866 = vrot.lane.b32.xlu0 %v820_v34, %s3703_s7  ;;  %v3177_v40 = vcombine.low %v271_v37, %v225_v33  ;;  %v548_v42 = vshll.u32 %v3830_v23, 16  ;;  %v553_v43 = vshll.u32 %v3498_v19, 16  ;;  %v3034_v52 = vld [vmem:[%s3793_s5 + $0x78] sm:$0xf]  ;;  %s3010_s12 = sshll.u32 %s203_s27, 1 }
  0x26   : > { %v558_v45 = vshrl.u32 %v3843_v38, 16  ;;  %v560_v46 = vshll.u32 %v3843_v38, 16  ;;  %v654_v47 = vshrl.u32 %v3837_v31, 16  ;;  %v822_v49 = vrot.slane %v3505_v39, 1  ;;  %v3857_v57 = vld [vmem:[%s3793_s5 + $0x7c] sm:$0xf] }
  0x27   : > { %v847_v44 = vsel %vm817_vm0, %v845_v35, %v846_v36  ;;  %v821_v48 = vrot.slane %v3177_v40, 1  ;;  %v565_v50 = vshll.u32 %v3505_v39, 16  ;;  %v550_v51 = vrot.slane %v548_v42, 1  ;;  %v3018_v62 = vld [vmem:[%s3793_s5 + $0x18] sm:$0xf]  ;;  %s205_s14 = scalar_lea.vmem [#allocation2], %s3010_s12 }
  0x28   : > { %884 = vrot.lane.b32.xlu1 %v847_v44, %s3703_s7  ;;  %v562_v53 = vrot.slane %v560_v46, 1  ;;  %v555_v54 = vrot.slane %v553_v43, 1  ;;  %v656_v55 = vshll.u32 %v3837_v31, 16  ;;  %v661_v56 = vshll.u32 %v3502_v28, 16  ;;  %v3863_v63 = vld [vmem:[%s3793_s5 + $0x1c] sm:$0xf] }
  0x29   : > { %v823_v58 = vsel %vm817_vm0, %v821_v48, %v822_v49  ;;  %v567_v59 = vrot.slane %v565_v50, 1  ;;  %v551_v60 = vor.u32 %v550_v51, %v546_v41  ;;  %v644_v61 = vshll.u32 %v3825_v18, 16  ;;  %v3870_v13 = vld [vmem:[%s3793_s5 + $0x74] ss:$0 sps:$4 sm:$0x11]   ;;  %s2897_s20 = sshll.u32 %s205_s14, 4  ;;  %s5334_s20 = int_to_ptr.vmem [resolvable:$true] %s2897_s20 }
  0x2a   : > { %868 = vrot.lane.b32.xlu0 %v823_v58, %s3703_s7  ;;  %v563_v0 = vor.u32 %v562_v53, %v558_v45  ;;  %v658_v3 = vrot.slane %v656_v55, 1  ;;  %v663_v6 = vrot.slane %v661_v56, 1  ;;  %v649_v7 = vshll.u32 %v3814_v8, 16  ;;  %v3875_v20 = vld [vmem:[%s3793_s5 + $0x14] ss:$0 sps:$4 sm:$0x11]  }
  0x2b   : > { %v556_v9 = vsel %vm544_vm1, %v551_v60, %v555_v54  ;;  %v646_v10 = vrot.slane %v644_v61, 1  ;;  %v3201_v12 = vcombine.low %v3034_v52, %v3857_v57  ;;  %v3193_v19 = vcombine.low %v3018_v62, %v3863_v63  ;;  %v3882_v24 = vld [vmem:[%s3793_s5 + $0x80] ss:$0 sps:$4 sm:$0x11]   ;;  %v3072_v40 = vld [vmem:[%s3793_s5 + $0x6c] sm:$0xe] }
  0x2c   : > { %v568_v14 = vsel %vm544_vm1, %v563_v0, %v567_v59  ;;  %v659_v15 = vor.u32 %v658_v3, %v654_v47  ;;  %v651_v16 = vrot.slane %v649_v7, 1  ;;  %v1155_v21 = vshrl.u32 %v3800_v2, 16  ;;  %v3064_v43 = vld [vmem:[%s3793_s5 + $0xc] sm:$0xe]  ;;  %v3073_v49 = vld [vmem:[%s3793_s5 + $0x78] sm:$0xe] }
  0x2d   : > { %739 = vrot.lane.b32.xlu1 %v568_v14, %s3704_s8  ;;  %v647_v8 = vor.u32 %v646_v10, %v642_v30  ;;  %v1159_v22 = vrot.slane %v1157_v11, 1  ;;  %v1169_v26 = vshll.u32 %v3201_v12, 16  ;;  %v1162_v27 = vshll.u32 %v3870_v13, 16  ;;  %v3893_v11 = vld [vmem:[%s3793_s5 + $0x20] ss:$0 sps:$4 sm:$0x11]  }
  0x2e   : > { %737 = vrot.lane.b32.xlu0 %v556_v9, %s3704_s8  ;;  %v664_v25 = vsel %vm544_vm1, %v659_v15, %v663_v6  ;;  %v1059_v28 = vshrl.u32 %v3807_v5, 16  ;;  %v1073_v30 = vshll.u32 %v3193_v19, 16  ;;  %v1063_v32 = vrot.slane %v1061_v17, 1  ;;  %v3065_v53 = vld [vmem:[%s3793_s5 + $0x18] sm:$0xe]  ;;  %s3638_s29 = scalar_lea.vmem %s5334_s20, 32 }
  0x2f   : > { %v652_v29 = vsel %vm544_vm1, %v647_v8, %v651_v16  ;;  %v1066_v2 = vshll.u32 %v3875_v20, 16  ;;  %v1160_v33 = vor.u32 %v1159_v22, %v1155_v21  ;;  %v1164_v34 = vrot.slane %v1162_v27, 1  ;;  %v3096_v54 = vld [vmem:[%s3793_s5 + $0x78] sm:$0xf]  ;;  %v3920_v60 = vld [vmem:[%s3793_s5 + $0x1c] sm:$0xf]  ;;  %p3639_p11 = scmp.ne.s32.totalorder %s5334_s20, %s3638_s29 }
  0x30   : > { %v1064_v35 = vor.u32 %v1063_v32, %v1059_v28  ;;  %v1167_v36 = vshrl.u32 %v3201_v12, 16  ;;  %v1171_v37 = vrot.slane %v1169_v26, 1  ;;  %v1174_v39 = vshll.u32 %v3882_v24, 16  ;;  %v3080_v55 = vld [vmem:[%s3793_s5 + $0x18] sm:$0xf] }
  0x31   : > { %755 = vrot.lane.b32.xlu1 %v664_v25, %s3704_s8  ;;  %v1068_v5 = vrot.slane %v1066_v2, 1  ;;  %v1071_v17 = vshrl.u32 %v3193_v19, 16  ;;  %v1075_v41 = vrot.slane %v1073_v30, 1  ;;  %v1078_v42 = vshll.u32 %v3893_v11, 16  ;;  %v3098_v7 = vld [vmem:[%s3793_s5 + $0x84] sm:$0xf]  ;;  %p3640_p12 = pnand %p3639_p11, %p3775_p5 }
  0x32   : > { %753 = vrot.lane.b32.xlu0 %v652_v29, %s3704_s8  ;;  %v3232_v44 = vcombine.low %v3072_v40, %v3797_v1  ;;  %v1165_v45 = vsel %vm544_vm1, %v1160_v33, %v1164_v34  ;;  %v1172_v46 = vor.u32 %v1171_v37, %v1167_v36  ;;  %v1176_v47 = vrot.slane %v1174_v39, 1  ;;  %v3912_v1 = vld [vmem:[%s3793_s5 + $0x7c] sm:$0xf]  ;;  %v3930_v9 = vld [vmem:[%s3793_s5 + $0x88] sm:$0xf] }
  0x33   : > { %v3224_v48 = vcombine.low %v3064_v43, %v3804_v4  ;;  %v1069_v50 = vsel %vm544_vm1, %v1064_v35, %v1068_v5  ;;  %v1076_v51 = vor.u32 %v1075_v41, %v1071_v17  ;;  %v1080_v52 = vrot.slane %v1078_v42, 1  ;;  %v3937_v14 = vld [vmem:[%s3793_s5 + $0x28] sm:$0xf]  ;;  %v3943_v21 = vld [vmem:[%s3793_s5 + $0x80] ss:$0 sps:$4 sm:$0x11]   ;;  %p3641_p13 = pneg %p3640_p12 }
  0x34   : > { %v3233_v56 = vcombine.low %v3073_v49, %v3857_v57  ;;  %v1177_v4 = vsel %vm544_vm1, %v1172_v46, %v1176_v47  ;;  %v1354_v58 = vrot.slane %v3232_v44, 1  ;;  %v1355_v59 = vrot.slane %v3870_v13, 1  ;;  %v3082_v13 = vld [vmem:[%s3793_s5 + $0x24] sm:$0xf]  ;;  %v242_v37 = vld [vmem:[%s3793_s5 + $0x78] sm:$0xf] }
  0x35   : > { %996 = vrot.lane.b32.xlu1 %v3201_v12, %s3702_s6  ;;  %v3225_v61 = vcombine.low %v3065_v53, %v3863_v63  ;;  %v1081_v62 = vsel %vm544_vm1, %v1076_v51, %v1080_v52  ;;  %v1330_v0 = vrot.slane %v3224_v48, 1  ;;  %v1331_v3 = vrot.slane %v3875_v20, 1  ;;  %v3950_v26 = vld [vmem:[%s3793_s5 + $0x20] ss:$0 sps:$4 sm:$0x11]  }
  0x36   : > { %980 = vrot.lane.b32.xlu0 %v3193_v19, %s3702_s6  ;;  %v3248_v57 = vcombine.low %v3096_v54, %v3912_v1  ;;  %v3240_v6 = vcombine.low %v3080_v55, %v3920_v60  ;;  %v1356_v10 = vsel %vm817_vm0, %v1354_v58, %v1355_v59  ;;  %v1357_v63 = vrot.slane %v3233_v56, 1  ;;  %v3956_v34 = vld [vmem:[%s3793_s5 + $0x8c] ss:$0 sps:$4 sm:$0x11]   ;;  %v3965_v39 = vld [vmem:[%s3793_s5 + $0x7c] sm:$0xf] }
  0x37   : > { %v1358_v12 = vrot.slane %v3882_v24, 1  ;;  %v1332_v15 = vsel %vm817_vm0, %v1330_v0, %v1331_v3  ;;  %v1333_v16 = vrot.slane %v3225_v61, 1  ;;  %v1334_v19 = vrot.slane %v3893_v11, 1  ;;  %v3961_v36 = vld [vmem:[%s3793_s5 + $0x2c] ss:$0 sps:$4 sm:$0x11]  }
  0x38   : > { %v1669_v20 = vshll.u32 %v3248_v57, 16  ;;  %v3249_v8 = vcombine.low %v3098_v7, %v3930_v9  ;;  %v1573_v22 = vshll.u32 %v3240_v6, 16  ;;  %v3241_v24 = vcombine.low %v3082_v13, %v3937_v14  ;;  %v226_v40 = vld [vmem:[%s3793_s5 + $0x18] sm:$0xf]  ;;  %v3969_v17 = vld [vmem:[%s3793_s5 + $0x1c] sm:$0xf] }
  0x39   : > { %1266 = vrot.lane.b32.xlu1 %v1165_v45, %s3705_s9  ;;  %v1359_v25 = vsel %vm817_vm0, %v1357_v63, %v1358_v12  ;;  %v1335_v27 = vsel %vm817_vm0, %v1333_v16, %v1334_v19  ;;  %v1667_v29 = vshrl.u32 %v3248_v57, 16  ;;  %v1674_v32 = vshll.u32 %v3943_v21, 16  ;;  %v3587_v41 = vld [vmem:[%s5405_s1] sm:$0xff]   ;;  %v3136_v42 = vld [vmem:[%s3793_s5 + $0x78] sm:$0xe]  ;;  %v3592_v56 = vld [vmem:[%s5405_s1 + $0x8] sm:$0xff]  }
  0x3a   : > { %1250 = vrot.lane.b32.xlu0 %v1069_v50, %s3705_s9  ;;  %v1681_v28 = vshll.u32 %v3249_v8, 16  ;;  %v1671_v30 = vrot.slane %v1669_v20, 1  ;;  %v1585_v2 = vshll.u32 %v3241_v24, 16  ;;  %v1571_v11 = vshrl.u32 %v3240_v6, 16  ;;  %v3128_v47 = vld [vmem:[%s3793_s5 + $0x18] sm:$0xe]  ;;  %3396 = vmatprep.subr.bf16.mxu0 %v3587_v41 }
  0x3b   : > { %v1575_v33 = vrot.slane %v1573_v22, 1  ;;  %v1578_v35 = vshll.u32 %v3950_v26, 16  ;;  %v1676_v43 = vrot.slane %v1674_v32, 1  ;;  %v1679_v44 = vshrl.u32 %v3249_v8, 16  ;;  %3434 = vmatprep.subr.bf16.mxu1 %v3587_v41  ;;  %3397 = vmatpush3.bf16.msra.mxu0 %v3587_v41  ;;  %v244_v7 = vld [vmem:[%s3793_s5 + $0x84] sm:$0xf] }
  0x3c   : > { %v1672_v5 = vor.u32 %v1671_v30, %v1667_v29  ;;  %v1683_v45 = vrot.slane %v1681_v28, 1  ;;  %v1686_v46 = vshll.u32 %v3956_v34, 16  ;;  %v1583_v48 = vshrl.u32 %v3241_v24, 16  ;;  %3437 = vmatpush3.bf16.msra.mxu1 %v3587_v41  ;;  %v3993_v61 = vld [vmem:[%s3793_s5 + $0x80] ss:$0 sps:$4 sm:$0x11]   ;;  %3398 = vmatprep.subr.bf16.mxu0 %v3592_v56 }
  0x3d   : > { %1268 = vrot.lane.b32.xlu1 %v1177_v4, %s3705_s9  ;;  %v1587_v49 = vrot.slane %v1585_v2, 1  ;;  %v1590_v50 = vshll.u32 %v3961_v36, 16  ;;  %v3981_v51 = vcombine.low %v242_v37, %v3965_v39  ;;  %v1576_v52 = vor.u32 %v1575_v33, %v1571_v11  ;;  %3435 = vmatprep.subr.bf16.mxu1 %v3592_v56  ;;  %v228_v13 = vld [vmem:[%s3793_s5 + $0x24] sm:$0xf] }
  0x3e   : > { %1252 = vrot.lane.b32.xlu0 %v1081_v62, %s3705_s9  ;;  %v1580_v53 = vrot.slane %v1578_v35, 1  ;;  %v3984_v54 = vcombine.low %v226_v40, %v3969_v17  ;;  %v3280_v55 = vcombine.low %v3136_v42, %v3912_v1  ;;  %v3272_v4 = vcombine.low %v3128_v47, %v3920_v60  ;;  %v3137_v16 = vld [vmem:[%s3793_s5 + $0x84] sm:$0xe]  ;;  %v4035_v40 = vld [vmem:[%s3793_s5 + $0x8c] ss:$0 sps:$4 sm:$0x11]  }
  0x3f   : > { %v1684_v58 = vor.u32 %v1683_v45, %v1679_v44  ;;  %v1688_v59 = vrot.slane %v1686_v46, 1  ;;  %v1677_v1 = vsel %vm544_vm1, %v1672_v5, %v1676_v43  ;;  %v1588_v62 = vor.u32 %v1587_v49, %v1583_v48  ;;  %3399 = vmatpush3.bf16.msra.mxu0 %v3592_v56 }
  0x40   : > { %v1592_v0 = vrot.slane %v1590_v50, 1  ;;  %v668_v3 = vshll.u32 %v3981_v51, 16  ;;  %v1581_v60 = vsel %vm544_vm1, %v1576_v52, %v1580_v53  ;;  %v1866_v63 = vrot.slane %v3280_v55, 1  ;;  %3438 = vmatpush3.bf16.msra.mxu1 %v3592_v56  ;;  %v280_v53 = vld [vmem:[%s3793_s5 + $0x78] sm:$0xe] }
  0x41   : > { %1394 = vrot.lane.b32.xlu1 %v1356_v10, %s3706_s10  ;;  %v4005_v10 = vld [vmem:[%s3793_s5 + $0x88] sm:$0xf]  ;;  %v1867_v12 = vrot.slane %v3943_v21, 1  ;;  %v1689_v19 = vsel %vm544_vm1, %v1684_v58, %v1688_v59  ;;  %v1842_v20 = vrot.slane %v3272_v4, 1  ;;  %v673_v22 = vshll.u32 %v3993_v61, 16 }
  0x42   : > { %1378 = vrot.lane.b32.xlu0 %v1332_v15, %s3706_s10  ;;  %v4010_v15 = vld [vmem:[%s3793_s5 + $0x28] sm:$0xf]  ;;  %v1593_v21 = vsel %vm544_vm1, %v1588_v62, %v1592_v0  ;;  %v4022_v28 = vcombine.low %v244_v7, %v4005_v10  ;;  %v570_v29 = vshrl.u32 %v3984_v54, 16  ;;  %v3281_v2 = vcombine.low %v3137_v16, %v3930_v9  ;;  %v4040_v9 = vld [vmem:[%s3793_s5 + $0x2c] ss:$0 sps:$4 sm:$0x11]  }
  0x43   : > { %v4027_v32 = vcombine.low %v228_v13, %v4010_v15  ;;  %v675_v33 = vrot.slane %v673_v22, 1  ;;  %v1868_v35 = vsel %vm817_vm0, %v1866_v63, %v1867_v12  ;;  %v1870_v45 = vrot.slane %v3956_v34, 1  ;;  %v273_v63 = vld [vmem:[%s3793_s5 + $0x24] sm:$0xe] }
  0x44   : > { %v680_v5 = vshll.u32 %v4022_v28, 16  ;;  %v1869_v44 = vrot.slane %v3281_v2, 1  ;;  %v1846_v47 = vrot.slane %v3961_v36, 1  ;;  %v678_v49 = vshrl.u32 %v4022_v28, 16  ;;  %v272_v36 = vld [vmem:[%s3793_s5 + $0x18] sm:$0xe] }
  0x45   : > { %1396 = vrot.lane.b32.xlu1 %v1359_v25, %s3706_s10  ;;  %v666_v25 = vshrl.u32 %v3981_v51, 16  ;;  %v685_v52 = vshll.u32 %v4035_v40, 16  ;;  %v582_v56 = vshrl.u32 %v4027_v32, 16  ;;  %v589_v4 = vshll.u32 %v4040_v9, 16 }
  0x46   : > { %1380 = vrot.lane.b32.xlu0 %v1335_v27, %s3706_s10  ;;  %v670_v27 = vrot.slane %v668_v3, 1  ;;  %v682_v50 = vrot.slane %v680_v5, 1  ;;  %v1871_v58 = vsel %vm817_vm0, %v1869_v44, %v1870_v45  ;;  %v3186_v62 = vcombine.low %v280_v53, %v3965_v39  ;;  %v281_v3 = vld [vmem:[%s3793_s5 + $0x84] sm:$0xe] }
  0x47   : > { %v3178_v0 = vcombine.low %v272_v36, %v3969_v17  ;;  %v591_v7 = vrot.slane %v589_v4, 1  ;;  %v849_v12 = vrot.slane %v3993_v61, 1  ;;  %v3187_v16 = vcombine.low %v281_v3, %v4005_v10 }
  0x48   : > { %v671_v37 = vor.u32 %v670_v27, %v666_v25  ;;  %v683_v59 = vor.u32 %v682_v50, %v678_v49  ;;  %v848_v17 = vrot.slane %v3186_v62, 1  ;;  %v3179_v61 = vcombine.low %v273_v63, %v4010_v15  ;;  %v4087_v15 = vld [vmem:[%s3793_s5 + $0x94] sm:$0xf]  ;;  %v3066_v62 = vld [vmem:[%s3793_s5 + $0x24] sm:$0xe] }
  0x49   : > { %1506 = vrot.lane.b32.xlu1 %v3248_v57, %s3707_s13  ;;  %v3999_v57 = vld [vmem:[%s3793_s5 + $0x20] ss:$0 sps:$4 sm:$0x11]   ;;  %v851_v10 = vrot.slane %v3187_v16, 1 }
  0x4a   : > { %1490 = vrot.lane.b32.xlu0 %v3240_v6, %s3707_s13  ;;  %v572_v6 = vshll.u32 %v3984_v54, 16  ;;  %v676_v48 = vsel %vm544_vm1, %v671_v37, %v675_v33  ;;  %v825_v13 = vrot.slane %v3999_v57, 1  ;;  %v850_v27 = vsel %vm817_vm0, %v848_v17, %v849_v12  ;;  %v3022_v33 = vld [vmem:[%s3793_s5 + $0x30] sm:$0xf] }
  0x4b   : > { %v827_v2 = vrot.slane %v3179_v61, 1  ;;  %v3075_v12 = vld [vmem:[%s3793_s5 + $0x90] sm:$0xe] }
  0x4c   : > { %v574_v30 = vrot.slane %v572_v6, 1  ;;  %v3235_v61 = vcombine.low %v3075_v12, %v4087_v15 }
  0x4d   : > { %1508 = vrot.lane.b32.xlu1 %v3249_v8, %s3707_s13  ;;  %v1843_v8 = vrot.slane %v3950_v26, 1  ;;  %v577_v26 = vshll.u32 %v3999_v57, 16  ;;  %v3020_v57 = vld [vmem:[%s3793_s5 + $0x24] sm:$0xf] }
  0x4e   : > { %1492 = vrot.lane.b32.xlu0 %v3241_v24, %s3707_s13  ;;  %v3129_v24 = vld [vmem:[%s3793_s5 + $0x24] sm:$0xe]  ;;  %v575_v42 = vor.u32 %v574_v30, %v570_v29  ;;  %v3038_v30 = vld [vmem:[%s3793_s5 + $0x90] sm:$0xf] }
  0x4f   : > { %v3273_v11 = vcombine.low %v3129_v24, %v3937_v14  ;;  %v1844_v41 = vsel %vm817_vm0, %v1842_v20, %v1843_v8  ;;  %v579_v43 = vrot.slane %v577_v26, 1  ;;  %v584_v14 = vshll.u32 %v4027_v32, 16  ;;  %v3036_v20 = vld [vmem:[%s3793_s5 + $0x84] sm:$0xf]  ;;  %v4071_v8 = vld [vmem:[%s3793_s5 + $0x88] sm:$0xf] }
  0x50   : > { %v4077_v24 = vld [vmem:[%s3793_s5 + $0x28] sm:$0xf]  ;;  %v3202_v25 = vcombine.low %v3036_v20, %v4071_v8 }
  0x51   : > { %1778 = vrot.lane.b32.xlu1 %v1677_v1, %s3708_s22  ;;  %v1845_v46 = vrot.slane %v3273_v11, 1  ;;  %v580_v55 = vsel %vm544_vm1, %v575_v42, %v579_v43  ;;  %v586_v34 = vrot.slane %v584_v14, 1  ;;  %v687_v1 = vrot.slane %v685_v52, 1  ;;  %v3547_v43 = vld [vmem:[%s3793_s5 + $0x8c] ss:$0 sps:$4 sm:$0x11]  }
  0x52   : > { %1762 = vrot.lane.b32.xlu0 %v1581_v60, %s3708_s22  ;;  %v3194_v29 = vcombine.low %v3020_v57, %v4077_v24  ;;  %v828_v11 = vrot.slane %v4040_v9, 1  ;;  %v1181_v37 = vshll.u32 %v3202_v25, 16  ;;  %v4103_v14 = vld [vmem:[%s3793_s5 + $0x2c] ss:$0 sps:$4 sm:$0x11]   ;;  %v1179_v45 = vshrl.u32 %v3202_v25, 16 }
  0x53   : > { %v1847_v60 = vsel %vm817_vm0, %v1845_v46, %v1846_v47  ;;  %v587_v6 = vor.u32 %v586_v34, %v582_v56  ;;  %v688_v39 = vsel %vm544_vm1, %v683_v59, %v687_v1  ;;  %v1186_v49 = vshll.u32 %v3547_v43, 16  ;;  %v4108_v52 = vld [vmem:[%s3793_s5 + $0x98] ss:$0 sps:$4 sm:$0x11]   ;;  %v3074_v56 = vld [vmem:[%s3793_s5 + $0x84] sm:$0xe] }
  0x54   : > { %v829_v9 = vsel %vm817_vm0, %v827_v2, %v828_v11  ;;  %v1183_v46 = vrot.slane %v1181_v37, 1  ;;  %v1083_v47 = vshrl.u32 %v3194_v29, 16  ;;  %v1090_v53 = vshll.u32 %v4103_v14, 16  ;;  %v3100_v57 = vld [vmem:[%s3793_s5 + $0x90] sm:$0xf] }
  0x55   : > { %1780 = vrot.lane.b32.xlu1 %v1689_v19, %s3708_s22  ;;  %v824_v19 = vrot.slane %v3178_v0, 1  ;;  %v592_v22 = vsel %vm544_vm1, %v587_v6, %v591_v7  ;;  %v1188_v36 = vrot.slane %v1186_v49, 1  ;;  %v1198_v1 = vshll.u32 %v4108_v52, 16  ;;  %v3102_v11 = vld [vmem:[%s3793_s5 + $0x9c] sm:$0xf] }
  0x56   : > { %1764 = vrot.lane.b32.xlu0 %v1593_v21, %s3708_s22  ;;  %v852_v21 = vrot.slane %v4035_v40, 1  ;;  %v3203_v40 = vcombine.low %v3038_v30, %v4087_v15  ;;  %v1184_v34 = vor.u32 %v1183_v46, %v1179_v45  ;;  %v1092_v0 = vrot.slane %v1090_v53, 1  ;;  %v4141_v15 = vld [vmem:[%s3793_s5 + $0x34] sm:$0xf]  ;;  %v4158_v45 = vld [vmem:[%s3793_s5 + $0x40] sm:$0xf] }
  0x57   : > { %v826_v26 = vsel %vm817_vm0, %v824_v19, %v825_v13  ;;  %v3234_v7 = vcombine.low %v3074_v56, %v4071_v8  ;;  %v3226_v63 = vcombine.low %v3066_v62, %v4077_v24  ;;  %v4132_v24 = vld [vmem:[%s3793_s5 + $0x94] sm:$0xf]  ;;  %v4161_v46 = vld [vmem:[%s3793_s5 + $0x98] ss:$0 sps:$4 sm:$0x11]  }
  0x58   : > { %v853_v5 = vsel %vm817_vm0, %v851_v10, %v852_v21  ;;  %v1193_v44 = vshll.u32 %v3203_v40, 16  ;;  %v1191_v4 = vshrl.u32 %v3203_v40, 16  ;;  %v1189_v13 = vsel %vm544_vm1, %v1184_v34, %v1188_v36  ;;  %v4167_v49 = vld [vmem:[%s3793_s5 + $0x38] ss:$0 sps:$4 sm:$0x11]  }
  0x59   : > { %1906 = vrot.lane.b32.xlu1 %v1868_v35, %s3709_s23  ;;  %v4093_v35 = vld [vmem:[%s3793_s5 + $0x34] sm:$0xf]  ;;  %v1360_v8 = vrot.slane %v3234_v7, 1  ;;  %v1361_v21 = vrot.slane %v3547_v43, 1  ;;  %v3250_v2 = vcombine.low %v3100_v57, %v4132_v24  ;;  %v1602_v62 = vshll.u32 %v4167_v49, 16 }
  0x5a   : > { %1890 = vrot.lane.b32.xlu0 %v1844_v41, %s3709_s23  ;;  %v1085_v41 = vshll.u32 %v3194_v29, 16  ;;  %v3195_v42 = vcombine.low %v3022_v33, %v4093_v35  ;;  %v1195_v59 = vrot.slane %v1193_v44, 1  ;;  %v4146_v33 = vld [vmem:[%s3793_s5 + $0xa0] sm:$0xf] }
  0x5b   : > { %v1362_v37 = vsel %vm817_vm0, %v1360_v8, %v1361_v21  ;;  %v1693_v44 = vshll.u32 %v3250_v2, 16  ;;  %v1691_v56 = vshrl.u32 %v3250_v2, 16  ;;  %v1604_v8 = vrot.slane %v1602_v62, 1 }
  0x5c   : > { %v1087_v50 = vrot.slane %v1085_v41, 1  ;;  %v1095_v3 = vshrl.u32 %v3195_v42, 16  ;;  %v1196_v16 = vor.u32 %v1195_v59, %v1191_v4  ;;  %v1698_v4 = vshll.u32 %v4161_v46, 16  ;;  %v4178_v59 = vld [vmem:[%s3793_s5 + $0x44] ss:$0 sps:$4 sm:$0x11]  }
  0x5d   : > { %757 = vrot.lane.b32.xlu1 %v676_v48, %s3704_s8  ;;  %v1097_v48 = vshll.u32 %v3195_v42, 16  ;;  %v1695_v34 = vrot.slane %v1693_v44, 1  ;;  %v3139_v44 = vld [vmem:[%s3793_s5 + $0x9c] sm:$0xe] }
  0x5e   : > { %741 = vrot.lane.b32.xlu0 %v580_v55, %s3704_s8  ;;  %v4112_v55 = vld [vmem:[%s3793_s5 + $0x38] ss:$0 sps:$4 sm:$0x11]  }
  0x5f   : > { %v1102_v6 = vshll.u32 %v4112_v55, 16  ;;  %v1340_v43 = vrot.slane %v4112_v55, 1  ;;  %v3138_v55 = vld [vmem:[%s3793_s5 + $0x90] sm:$0xe] }
  0x60   : > { %v3282_v7 = vcombine.low %v3138_v55, %v4132_v24  ;;  %v1849_v55 = vrot.slane %v4167_v49, 1 }
  0x61   : > { %1908 = vrot.lane.b32.xlu1 %v1871_v58, %s3709_s23  ;;  %v1088_v58 = vor.u32 %v1087_v50, %v1083_v47  ;;  %v1104_v20 = vrot.slane %v1102_v6, 1  ;;  %v3597_v6 = vld [vmem:[%s5405_s1 + $0x10] ss:$0 sps:$4 sm:$0x33]  }
  0x62   : > { %1892 = vrot.lane.b32.xlu0 %v1847_v60, %s3709_s23  ;;  %v1099_v60 = vrot.slane %v1097_v48, 1  ;;  %3440 = vmatprep.subr.msk.bf16.mxu0 %vm2239_vm2, %v3597_v6 }
  0x63   : > { %v1093_v17 = vsel %vm544_vm1, %v1088_v58, %v1092_v0  ;;  %v4175_v58 = vld [vmem:[%s3793_s5 + $0xa4] ss:$0 sps:$4 sm:$0x11]   ;;  %v246_v0 = vld [vmem:[%s3793_s5 + $0x90] sm:$0xf]  ;;  %3441 = vmatprep.subr.msk.bf16.mxu1 %vm2239_vm2, %v3597_v6 }
  0x64   : > { %v1100_v19 = vor.u32 %v1099_v60, %v1095_v3  ;;  %v4184_v60 = vld [vmem:[%s3793_s5 + $0x94] sm:$0xf] }
  0x65   : > { %759 = vrot.lane.b32.xlu1 %v688_v39, %s3704_s8  ;;  %v1200_v39 = vrot.slane %v1198_v1, 1  ;;  %v4199_v57 = vcombine.low %v246_v0, %v4184_v60 }
  0x66   : > { %743 = vrot.lane.b32.xlu0 %v592_v22, %s3704_s8  ;;  %v3067_v22 = vld [vmem:[%s3793_s5 + $0x30] sm:$0xe]  ;;  %v1105_v30 = vsel %vm544_vm1, %v1100_v19, %v1104_v20  ;;  %v1710_v19 = vshll.u32 %v4175_v58, 16 }
  0x67   : > { %v1201_v10 = vsel %vm544_vm1, %v1196_v16, %v1200_v39  ;;  %v4192_v16 = vld [vmem:[%s3793_s5 + $0x34] sm:$0xf]  ;;  %v1700_v39 = vrot.slane %v1698_v4, 1  ;;  %v3130_v20 = vld [vmem:[%s3793_s5 + $0x30] sm:$0xe]  ;;  %5415 = vst [vmem:[#allocation5_spill] sm:$0xff] %v4199_v57 }
  0x69   : > { %886 = vrot.lane.b32.xlu1 %v850_v27, %s3703_s7  ;;  %v1337_v27 = vrot.slane %v4103_v14, 1  ;;  %v3086_v14 = vld [vmem:[%s3793_s5 + $0x3c] sm:$0xf] }
  0x6a   : > { %870 = vrot.lane.b32.xlu0 %v826_v26, %s3703_s7  ;;  %v3084_v26 = vld [vmem:[%s3793_s5 + $0x30] sm:$0xf]  ;;  %v3243_v53 = vcombine.low %v3086_v14, %v4158_v45  ;;  %v4223_v14 = vld [vmem:[%s3793_s5 + $0xa0] sm:$0xf] }
  0x6c   : > { %v1609_v3 = vshll.u32 %v3243_v53, 16 }
  0x6d   : > { %888 = vrot.lane.b32.xlu1 %v853_v5, %s3703_s7  ;;  %v3242_v5 = vcombine.low %v3084_v26, %v4141_v15  ;;  %v4208_v26 = vld [vmem:[%s3793_s5 + $0x98] ss:$0 sps:$4 sm:$0x11]  }
  0x6e   : > { %872 = vrot.lane.b32.xlu0 %v829_v9, %s3703_s7  ;;  %v3251_v9 = vcombine.low %v3102_v11, %v4146_v33  ;;  %v1611_v24 = vrot.slane %v1609_v3, 1  ;;  %v1872_v11 = vrot.slane %v3282_v7, 1  ;;  %v697_v4 = vshll.u32 %v4208_v26, 16 }
  0x6f   : > { %v1597_v48 = vshll.u32 %v3242_v5, 16  ;;  %v1595_v36 = vshrl.u32 %v3242_v5, 16  ;;  %v3283_v7 = vcombine.low %v3139_v44, %v4146_v33 }
  0x70   : > { %v1703_v12 = vshrl.u32 %v3251_v9, 16 }
  0x71   : > { %998 = vrot.lane.b32.xlu1 %v3202_v25, %s3702_s6  ;;  %v1336_v25 = vrot.slane %v3226_v63, 1  ;;  %v1599_v1 = vrot.slane %v1597_v48, 1  ;;  %v1696_v63 = vor.u32 %v1695_v34, %v1691_v56  ;;  %v4228_v48 = vld [vmem:[%s3793_s5 + $0x40] sm:$0xf]  ;;  %v690_v56 = vshrl.u32 %v4199_v57, 16 }
  0x72   : > { %982 = vrot.lane.b32.xlu0 %v3194_v29, %s3702_s6  ;;  %v3227_v29 = vcombine.low %v3067_v22, %v4093_v35  ;;  %v1363_v35 = vrot.slane %v3235_v61, 1  ;;  %v1607_v61 = vshrl.u32 %v3243_v53, 16 }
  0x73   : > { %v1338_v41 = vsel %vm817_vm0, %v1336_v25, %v1337_v27  ;;  %v1600_v22 = vor.u32 %v1599_v1, %v1595_v36  ;;  %v2241_v25 = vsel %vm2239_vm2, %v3597_v6, 0  ;;  %v3274_v27 = vcombine.low %v3130_v20, %v4141_v15 }
  0x74   : > { %3401 = vmatpush3.bf16.msra.mxu0 %v2241_v25  ;;  %3439 = vmatpush3.bf16.msra.mxu1 %v2241_v25  ;;  %v692_v15 = vshll.u32 %v4199_v57, 16  ;;  %v1876_v25 = vrot.slane %v4175_v58, 1 }
  0x75   : > { %1000 = vrot.lane.b32.xlu1 %v3203_v40, %s3702_s6  ;;  %v1364_v40 = vrot.slane %v4108_v52, 1  ;;  %v1705_v52 = vshll.u32 %v3251_v9, 16 }
  0x76   : > { %984 = vrot.lane.b32.xlu0 %v3195_v42, %s3702_s6  ;;  %v1339_v42 = vrot.slane %v3227_v29, 1  ;;  %v694_v34 = vrot.slane %v692_v15, 1  ;;  %v282_v15 = vld [vmem:[%s3793_s5 + $0x90] sm:$0xe] }
  0x77   : > { %v1365_v47 = vsel %vm817_vm0, %v1363_v35, %v1364_v40  ;;  %v4215_v35 = vld [vmem:[%s3793_s5 + $0x38] ss:$0 sps:$4 sm:$0x11]   ;;  %v1605_v40 = vsel %vm544_vm1, %v1600_v22, %v1604_v8 }
  0x78   : > { %v1341_v50 = vsel %vm817_vm0, %v1339_v42, %v1340_v43  ;;  %v601_v36 = vshll.u32 %v4215_v35, 16 }
  0x79   : > { %1270 = vrot.lane.b32.xlu1 %v1189_v13, %s3705_s9  ;;  %v230_v13 = vld [vmem:[%s3793_s5 + $0x30] sm:$0xf] }
  0x7a   : > { %1254 = vrot.lane.b32.xlu0 %v1093_v17, %s3705_s9  ;;  %v1707_v17 = vrot.slane %v1705_v52, 1  ;;  %v4203_v21 = vcombine.low %v230_v13, %v4192_v16  ;;  %v695_v13 = vor.u32 %v694_v34, %v690_v56 }
  0x7c   : > { %5416 = vst [vmem:[#allocation6_spill] sm:$0xff] %v4203_v21  ;;  %v1708_v29 = vor.u32 %v1707_v17, %v1703_v12  ;;  %v596_v43 = vshll.u32 %v4203_v21, 16  ;;  %v594_v0 = vshrl.u32 %v4203_v21, 16  ;;  %v603_v17 = vrot.slane %v601_v36, 1 }
  0x7d   : > { %1272 = vrot.lane.b32.xlu1 %v1201_v10, %s3705_s9  ;;  %v1614_v10 = vshll.u32 %v4178_v59, 16 }
  0x7e   : > { %1256 = vrot.lane.b32.xlu0 %v1105_v30, %s3705_s9  ;;  %v1712_v30 = vrot.slane %v1710_v19, 1  ;;  %v598_v3 = vrot.slane %v596_v43, 1  ;;  %v4256_v19 = vld [vmem:[%s3793_s5 + $0xa4] ss:$0 sps:$4 sm:$0x11]  }
  0x7f   : > { %v1616_v42 = vrot.slane %v1614_v10, 1  ;;  %v1875_v10 = vrot.slane %v3283_v7, 1  ;;  %v274_v43 = vld [vmem:[%s3793_s5 + $0x30] sm:$0xe] }
  0x80   : > { %v1713_v52 = vsel %vm544_vm1, %v1708_v29, %v1712_v30  ;;  %v599_v8 = vor.u32 %v598_v3, %v594_v0  ;;  %v1852_v29 = vrot.slane %v4178_v59, 1  ;;  %v3180_v34 = vcombine.low %v274_v43, %v4192_v16  ;;  %v3040_v3 = vld [vmem:[%s3793_s5 + $0x9c] sm:$0xf] }
  0x81   : > { %1398 = vrot.lane.b32.xlu1 %v1362_v37, %s3706_s10  ;;  %v1873_v37 = vrot.slane %v4161_v46, 1  ;;  %v3131_v46 = vld [vmem:[%s3793_s5 + $0x3c] sm:$0xe]  ;;  %v1877_v44 = vsel %vm817_vm0, %v1875_v10, %v1876_v25  ;;  %v855_v0 = vrot.slane %v4208_v26, 1  ;;  %v3042_v25 = vld [vmem:[%s3793_s5 + $0xa8] sm:$0xf] }
  0x82   : > { %1382 = vrot.lane.b32.xlu0 %v1338_v41, %s3706_s10  ;;  %v1612_v41 = vor.u32 %v1611_v24, %v1607_v61 }
  0x83   : > { %v1874_v12 = vsel %vm817_vm0, %v1872_v11, %v1873_v37  ;;  %v709_v37 = vshll.u32 %v4256_v19, 16 }
  0x84   : > { %v1617_v62 = vsel %vm544_vm1, %v1612_v41, %v1616_v42 }
  0x85   : > { %1400 = vrot.lane.b32.xlu1 %v1365_v47, %s3706_s10  ;;  %v232_v47 = vld [vmem:[%s3793_s5 + $0x3c] sm:$0xf] }
  0x86   : > { %1384 = vrot.lane.b32.xlu0 %v1341_v50, %s3706_s10  ;;  %v4246_v49 = vcombine.low %v232_v47, %v4228_v48 }
  0x88   : > { %5418 = vst [vmem:[#allocation8_spill] sm:$0xff] %v4246_v49  ;;  %v608_v61 = vshll.u32 %v4246_v49, 16  ;;  %v606_v41 = vshrl.u32 %v4246_v49, 16 }
  0x89   : > { %1510 = vrot.lane.b32.xlu1 %v3250_v2, %s3707_s13  ;;  %v1701_v2 = vsel %vm544_vm1, %v1696_v63, %v1700_v39  ;;  %v3275_v63 = vcombine.low %v3131_v46, %v4158_v45  ;;  %v699_v39 = vrot.slane %v697_v4, 1  ;;  %v4263_v45 = vld [vmem:[%s3793_s5 + $0x44] ss:$0 sps:$4 sm:$0x11]   ;;  %v711_v46 = vrot.slane %v709_v37, 1 }
  0x8a   : > { %1494 = vrot.lane.b32.xlu0 %v3242_v5, %s3707_s13  ;;  %v610_v42 = vrot.slane %v608_v61, 1  ;;  %v613_v58 = vshll.u32 %v4263_v45, 16  ;;  %v283_v4 = vld [vmem:[%s3793_s5 + $0x9c] sm:$0xe] }
  0x8b   : > { %v700_v30 = vsel %vm544_vm1, %v695_v13, %v699_v39  ;;  %v830_v39 = vrot.slane %v3180_v34, 1 }
  0x8c   : > { %v615_v56 = vrot.slane %v613_v58, 1 }
  0x8d   : > { %1512 = vrot.lane.b32.xlu1 %v3251_v9, %s3707_s13  ;;  %v248_v9 = vld [vmem:[%s3793_s5 + $0x9c] sm:$0xf] }
  0x8e   : > { %1496 = vrot.lane.b32.xlu0 %v3243_v53, %s3707_s13  ;;  %v1848_v53 = vrot.slane %v3274_v27, 1  ;;  %v4241_v1 = vcombine.low %v248_v9, %v4223_v14  ;;  %v1851_v27 = vrot.slane %v3275_v63, 1  ;;  %v3188_v9 = vcombine.low %v282_v15, %v4184_v60  ;;  %v275_v60 = vld [vmem:[%s3793_s5 + $0x3c] sm:$0xe]  ;;  %v3026_v15 = vld [vmem:[%s3793_s5 + $0x48] sm:$0xf] }
  0x8f   : > { %v3189_v63 = vcombine.low %v283_v4, %v4223_v14  ;;  %v3181_v26 = vcombine.low %v275_v60, %v4228_v48 }
  0x90   : > { %5417 = vst [vmem:[#allocation7_spill] sm:$0xff] %v4241_v1  ;;  %v704_v20 = vshll.u32 %v4241_v1, 16  ;;  %v1850_v33 = vsel %vm817_vm0, %v1848_v53, %v1849_v55  ;;  %v1853_v53 = vsel %vm817_vm0, %v1851_v27, %v1852_v29  ;;  %v611_v55 = vor.u32 %v610_v42, %v606_v41  ;;  %v4322_v27 = vld [vmem:[%s3793_s5 + $0xac] sm:$0xf] }
  0x91   : > { %v4218_v5 = vpop.permute.xlu1 %994  ;;  %1782 = vrot.lane.b32.xlu1 %v1701_v2, %s3708_s22  ;;  %v702_v2 = vshrl.u32 %v4241_v1, 16  ;;  %v857_v10 = vrot.slane %v3189_v63, 1  ;;  %v3205_v41 = vcombine.low %v3042_v25, %v4322_v27  ;;  %v4337_v42 = vld [vmem:[%s3793_s5 + $0xa4] ss:$0 sps:$4 sm:$0x11]  }
  0x92   : > { %v4232_v50 = vpop.permute.xlu0 %978  ;;  %1766 = vrot.lane.b32.xlu0 %v1605_v40, %s3708_s22  ;;  %v706_v11 = vrot.slane %v704_v20, 1  ;;  %v604_v40 = vsel %vm544_vm1, %v599_v8, %v603_v17  ;;  %v616_v13 = vsel %vm544_vm1, %v611_v55, %v615_v56  ;;  %v831_v17 = vrot.slane %v4215_v35, 1  ;;  %v3024_v20 = vld [vmem:[%s3793_s5 + $0x3c] sm:$0xf] }
  0x93   : > { %v858_v35 = vrot.slane %v4256_v19, 1  ;;  %v1217_v55 = vshll.u32 %v3205_v41, 16  ;;  %v1210_v34 = vshll.u32 %v4337_v42, 16  ;;  %v4360_v63 = vld [vmem:[%s3793_s5 + $0x50] ss:$0 sps:$4 sm:$0x11]  }
  0x94   : > { %v707_v47 = vor.u32 %v706_v11, %v702_v2  ;;  %v833_v2 = vrot.slane %v3181_v26, 1  ;;  %v834_v11 = vrot.slane %v4263_v45, 1  ;;  %v3076_v26 = vld [vmem:[%s3793_s5 + $0x9c] sm:$0xe] }
  0x95   : > { %v4248_v6 = vpop.permute.xlu1 %882  ;;  %1784 = vrot.lane.b32.xlu1 %v1713_v52, %s3708_s22  ;;  %v859_v58 = vsel %vm817_vm0, %v857_v10, %v858_v35  ;;  %v1219_v10 = vrot.slane %v1217_v55, 1  ;;  %v3068_v25 = vld [vmem:[%s3793_s5 + $0x3c] sm:$0xe] }
  0x96   : > { %1768 = vrot.lane.b32.xlu0 %v1617_v62, %s3708_s22  ;;  %v854_v62 = vrot.slane %v3188_v9, 1  ;;  %v712_v7 = vsel %vm544_vm1, %v707_v47, %v711_v46  ;;  %v4342_v9 = vld [vmem:[%s3793_s5 + $0x44] ss:$0 sps:$4 sm:$0x11]  }
  0x97   : > { %v4259_v22 = vpop.permute.xlu0 %866 }
  0x98   : > { %v856_v61 = vsel %vm817_vm0, %v854_v62, %v855_v0  ;;  %v4354_v62 = vld [vmem:[%s3793_s5 + $0xb0] ss:$0 sps:$4 sm:$0x11]  }
  0x99   : > { %1910 = vrot.lane.b32.xlu1 %v1874_v12, %s3709_s23  ;;  %v4301_v12 = vld [vmem:[%s3793_s5 + $0xa0] sm:$0xf]  ;;  %v1222_v35 = vshll.u32 %v4354_v62, 16 }
  0x9a   : > { %v4267_v24 = vpop.permute.xlu1 %884  ;;  %1894 = vrot.lane.b32.xlu0 %v1850_v33, %s3709_s23  ;;  %v4310_v33 = vld [vmem:[%s3793_s5 + $0x40] sm:$0xf]  ;;  %v3204_v14 = vcombine.low %v3040_v3, %v4301_v12 }
  0x9b   : > { %v3196_v48 = vcombine.low %v3024_v20, %v4310_v33  ;;  %v1212_v20 = vrot.slane %v1210_v34, 1  ;;  %v1224_v34 = vrot.slane %v1222_v35, 1 }
  0x9c   : > { %v4279_v59 = vpop.permute.xlu0 %868  ;;  %v1205_v19 = vshll.u32 %v3204_v14, 16 }
  0x9d   : > { %761 = vrot.lane.b32.xlu1 %v700_v30, %s3704_s8  ;;  %v832_v30 = vsel %vm817_vm0, %v830_v39, %v831_v17  ;;  %v1109_v43 = vshll.u32 %v3196_v48, 16  ;;  %v1107_v4 = vshrl.u32 %v3196_v48, 16  ;;  %v1215_v17 = vshrl.u32 %v3205_v41, 16 }
  0x9e   : > { %745 = vrot.lane.b32.xlu0 %v604_v40, %s3704_s8  ;;  %v4332_v40 = vld [vmem:[%s3793_s5 + $0x4c] sm:$0xf]  ;;  %v1207_v56 = vrot.slane %v1205_v19, 1 }
  0x9f   : > { %v4286_v52 = vpop.permute.xlu1 %739  ;;  %v3197_v47 = vcombine.low %v3026_v15, %v4332_v40  ;;  %v1111_v60 = vrot.slane %v1109_v43, 1  ;;  %v1126_v15 = vshll.u32 %v4360_v63, 16  ;;  %v4376_v43 = vld [vmem:[%s3793_s5 + $0xac] sm:$0xf] }
  0xa0   : > { %v4291_v36 = vpop.permute.xlu0 %737 }
  0xa1   : > { %1912 = vrot.lane.b32.xlu1 %v1877_v44, %s3709_s23  ;;  %v835_v44 = vsel %vm817_vm0, %v833_v2, %v834_v11  ;;  %v1121_v3 = vshll.u32 %v3197_v47, 16  ;;  %v1119_v11 = vshrl.u32 %v3197_v47, 16 }
  0xa2   : > { %1896 = vrot.lane.b32.xlu0 %v1853_v53, %s3709_s23  ;;  %v1203_v53 = vshrl.u32 %v3204_v14, 16 }
  0xa3   : > { %v4303_v16 = vpop.permute.xlu1 %755 }
  0xa4   : > { %v4312_v8 = vpop.permute.xlu0 %753  ;;  %v1208_v39 = vor.u32 %v1207_v56, %v1203_v53  ;;  %v3077_v53 = vld [vmem:[%s3793_s5 + $0xa8] sm:$0xe]  ;;  %v1220_v56 = vor.u32 %v1219_v10, %v1215_v17  ;;  %v4402_v10 = vld [vmem:[%s3793_s5 + $0xb8] sm:$0xf] }
  0xa5   : > { %763 = vrot.lane.b32.xlu1 %v712_v7, %s3704_s8  ;;  %v1114_v7 = vshll.u32 %v4342_v9, 16  ;;  %v3237_v17 = vcombine.low %v3077_v53, %v4322_v27  ;;  %v4410_v27 = vld [vmem:[%s3793_s5 + $0x58] sm:$0xf] }
  0xa6   : > { %747 = vrot.lane.b32.xlu0 %v616_v13, %s3704_s8  ;;  %v1213_v55 = vsel %vm544_vm1, %v1208_v39, %v1212_v20  ;;  %v4395_v39 = vld [vmem:[%s3793_s5 + $0x4c] sm:$0xf]  ;;  %v1367_v20 = vrot.slane %v4337_v42, 1 }
  0xa7   : > { %v4324_v29 = vpop.permute.xlu1 %996  ;;  %v1116_v2 = vrot.slane %v1114_v7, 1  ;;  %v1128_v7 = vrot.slane %v1126_v15, 1 }
  0xa8   : > { %v4328_v37 = vpop.permute.xlu0 %980 }
  0xa9   : > { %890 = vrot.lane.b32.xlu1 %v856_v61, %s3703_s7  ;;  %v1112_v61 = vor.u32 %v1111_v60, %v1107_v4  ;;  %v3069_v4 = vld [vmem:[%s3793_s5 + $0x48] sm:$0xe] }
  0xaa   : > { %874 = vrot.lane.b32.xlu0 %v832_v30, %s3703_s7  ;;  %v3229_v35 = vcombine.low %v3069_v4, %v4332_v40  ;;  %v4420_v40 = vld [vmem:[%s3793_s5 + $0xb0] ss:$0 sps:$4 sm:$0x11]   ;;  %v1370_v4 = vrot.slane %v4354_v62, 1 }
  0xab   : > { %v4344_v45 = vpop.permute.xlu1 %1266 }
  0xac   : > { %v4348_v46 = vpop.permute.xlu0 %1250 }
  0xad   : > { %892 = vrot.lane.b32.xlu1 %v859_v58, %s3703_s7  ;;  %v3104_v58 = vld [vmem:[%s3793_s5 + $0xa8] sm:$0xf] }
  0xae   : > { %876 = vrot.lane.b32.xlu0 %v835_v44, %s3703_s7  ;;  %v3228_v44 = vcombine.low %v3068_v25, %v4310_v33  ;;  %v1225_v25 = vsel %vm544_vm1, %v1220_v56, %v1224_v34 }
  0xaf   : > { %v4356_v0 = vpop.permute.xlu1 %1268 }
  0xb0   : > { %v4362_v13 = vpop.permute.xlu0 %1252 }
  0xb1   : > { %1002 = vrot.lane.b32.xlu1 %v3204_v14, %s3702_s6  ;;  %v1123_v14 = vrot.slane %v1121_v3, 1  ;;  %v1117_v3 = vsel %vm544_vm1, %v1112_v61, %v1116_v2  ;;  %v3106_v61 = vld [vmem:[%s3793_s5 + $0xb4] sm:$0xf]  ;;  %v1342_v2 = vrot.slane %v3228_v44, 1 }
  0xb2   : > { %986 = vrot.lane.b32.xlu0 %v3196_v48, %s3702_s6  ;;  %v3236_v48 = vcombine.low %v3076_v26, %v4301_v12  ;;  %v4425_v44 = vcombine.low %v3106_v61, %v4402_v10 }
  0xb3   : > { %v4369_v30 = vpop.permute.xlu1 %1394  ;;  %v1124_v12 = vor.u32 %v1123_v14, %v1119_v11  ;;  %v1343_v11 = vrot.slane %v4342_v9, 1  ;;  %v3090_v14 = vld [vmem:[%s3793_s5 + $0x54] sm:$0xf] }
  0xb4   : > { %v4372_v19 = vpop.permute.xlu0 %1378  ;;  %v1366_v26 = vrot.slane %v3236_v48, 1  ;;  %v4430_v56 = vcombine.low %v3090_v14, %v4410_v27  ;;  %v1729_v62 = vshll.u32 %v4425_v44, 16 }
  0xb5   : > { %1004 = vrot.lane.b32.xlu1 %v3205_v41, %s3702_s6  ;;  %v4389_v41 = vcombine.low %v3104_v58, %v4376_v43  ;;  %v1129_v58 = vsel %vm544_vm1, %v1124_v12, %v1128_v7  ;;  %v1344_v34 = vsel %vm817_vm0, %v1342_v2, %v1343_v11  ;;  %v1346_v12 = vrot.slane %v4360_v63, 1  ;;  %v4445_v63 = vld [vmem:[%s3793_s5 + $0x50] ss:$0 sps:$4 sm:$0x11]  }
  0xb6   : > { %988 = vrot.lane.b32.xlu0 %v3197_v47, %s3702_s6  ;;  %v3088_v47 = vld [vmem:[%s3793_s5 + $0x48] sm:$0xf]  ;;  %v1368_v9 = vsel %vm817_vm0, %v1366_v26, %v1367_v20  ;;  %v1722_v20 = vshll.u32 %v4420_v40, 16  ;;  %v4453_v2 = vld [vmem:[%s3793_s5 + $0xbc] ss:$0 sps:$4 sm:$0x11]   ;;  %v1924_v11 = vsel %vm1922_vm3, %v3830_v23, %v4291_v36 }
  0xb7   : > { %v4385_v60 = vpop.permute.xlu1 %1396  ;;  %v1717_v42 = vshll.u32 %v4389_v41, 16  ;;  %v4417_v48 = vcombine.low %v3088_v47, %v4395_v39 }
  0xb8   : > { %v4391_v33 = vpop.permute.xlu0 %1380  ;;  %v1724_v1 = vrot.slane %v1722_v20, 1 }
  0xb9   : > { %1274 = vrot.lane.b32.xlu1 %v1213_v55, %s3705_s9  ;;  %v1369_v55 = vrot.slane %v3237_v17, 1  ;;  %v1621_v47 = vshll.u32 %v4417_v48, 16  ;;  %v1715_v17 = vshrl.u32 %v4389_v41, 16  ;;  %v1719_v26 = vrot.slane %v1717_v42, 1 }
  0xba   : > { %1258 = vrot.lane.b32.xlu0 %v1117_v3, %s3705_s9  ;;  %v1345_v3 = vrot.slane %v3229_v35, 1  ;;  %v1940_v35 = vsel %vm1922_vm3, %v3825_v18, %v4312_v8  ;;  %v3140_v18 = vld [vmem:[%s3793_s5 + $0xa8] sm:$0xe]  ;;  %v4463_v8 = vld [vmem:[%s3793_s5 + $0x5c] ss:$0 sps:$4 sm:$0x11]  }
  0xbb   : > { %v4412_v15 = vpop.permute.xlu1 %1506  ;;  %v1371_v14 = vsel %vm817_vm0, %v1369_v55, %v1370_v4  ;;  %v1720_v49 = vor.u32 %v1719_v26, %v1715_v17  ;;  %v1619_v21 = vshrl.u32 %v4417_v48, 16  ;;  %v1623_v57 = vrot.slane %v1621_v47, 1 }
  0xbc   : > { %v4422_v53 = vpop.permute.xlu0 %1490  ;;  %v1973_v23 = vsel %vm1955_vm4, %v1940_v35, %v4248_v6  ;;  %v1727_v55 = vshrl.u32 %v4425_v44, 16  ;;  %v1731_v4 = vrot.slane %v1729_v62, 1  ;;  %v1631_v47 = vshrl.u32 %v4430_v56, 16 }
  0xbd   : > { %1276 = vrot.lane.b32.xlu1 %v1225_v25, %s3705_s9  ;;  %v1633_v25 = vshll.u32 %v4430_v56, 16  ;;  %v3284_v6 = vcombine.low %v3140_v18, %v4376_v43  ;;  %v1638_v20 = vshll.u32 %v4463_v8, 16  ;;  %v1725_v35 = vsel %vm544_vm1, %v1720_v49, %v1724_v1 }
  0xbe   : > { %1260 = vrot.lane.b32.xlu0 %v1129_v58, %s3705_s9  ;;  %v1347_v58 = vsel %vm817_vm0, %v1345_v3, %v1346_v12  ;;  %v1957_v3 = vsel %vm1955_vm4, %v1924_v11, %v4259_v22  ;;  %v1734_v12 = vshll.u32 %v4453_v2, 16  ;;  %v2006_v22 = vsel %vm1988_vm5, %v1973_v23, %v4218_v5  ;;  %v250_v11 = vld [vmem:[%s3793_s5 + $0xa8] sm:$0xf]  ;;  %v4497_v23 = vld [vmem:[%s3793_s5 + $0x4c] sm:$0xf] }
  0xbf   : > { %v4436_v7 = vpop.permute.xlu1 %1508  ;;  %v1635_v17 = vrot.slane %v1633_v25, 1  ;;  %v1624_v25 = vor.u32 %v1623_v57, %v1619_v21  ;;  %v2039_v43 = vsel %vm2021_vm6, %v2006_v22, %v4344_v45  ;;  %v234_v5 = vld [vmem:[%s3793_s5 + $0x48] sm:$0xf]  ;;  %v252_v22 = vld [vmem:[%s3793_s5 + $0xb4] sm:$0xf] }
  0xc0   : > { %v4441_v61 = vpop.permute.xlu0 %1492  ;;  %v2072_v57 = vsel %vm2054_vm7, %v2039_v43, %v4369_v30  ;;  %v1736_v21 = vrot.slane %v1734_v12, 1  ;;  %v1942_v30 = vsel %vm1922_vm3, %v3837_v31, %v4303_v16  ;;  %v1878_v31 = vrot.slane %v3284_v6, 1  ;;  %v4529_v16 = vld [vmem:[%s3793_s5 + $0xb0] ss:$0 sps:$4 sm:$0x11]  }
  0xc1   : > { %1402 = vrot.lane.b32.xlu1 %v1368_v9, %s3706_s10  ;;  %v3132_v9 = vld [vmem:[%s3793_s5 + $0x48] sm:$0xe]  ;;  %v1636_v49 = vor.u32 %v1635_v17, %v1631_v47  ;;  %v2105_v45 = vsel %vm2087_vm8, %v2072_v57, %v4412_v15  ;;  %v4521_v15 = vcombine.low %v234_v5, %v4497_v23  ;;  %v1975_v47 = vsel %vm1955_vm4, %v1942_v30, %v4267_v24 }
  0xc2   : > { %1386 = vrot.lane.b32.xlu0 %v1344_v34, %s3706_s10  ;;  %v1626_v34 = vshll.u32 %v4445_v63, 16  ;;  %v3276_v26 = vcombine.low %v3132_v9, %v4395_v39  ;;  %v1990_v39 = vsel %vm1988_vm5, %v1957_v3, %v4232_v50  ;;  %v1732_v9 = vor.u32 %v1731_v4, %v1727_v55 }
  0xc3   : > { %v1779_v42 = vpop.permute.xlu1 %1778  ;;  %v2023_v1 = vsel %vm2021_vm6, %v1990_v39, %v4348_v46  ;;  %v1855_v17 = vrot.slane %v4445_v63, 1  ;;  %v721_v43 = vshll.u32 %v4529_v16, 16  ;;  %v236_v39 = vld [vmem:[%s3793_s5 + $0x54] sm:$0xf] }
  0xc4   : > { %v1763_v36 = vpop.permute.xlu0 %1762  ;;  %v1628_v18 = vrot.slane %v1626_v34, 1  ;;  %v2056_v50 = vsel %vm2054_vm7, %v2023_v1, %v4372_v19  ;;  %v1640_v34 = vrot.slane %v1638_v20, 1  ;;  %v2138_v19 = vsel %vm2120_vm9, %v2105_v45, %v1779_v42 }
  0xc5   : > { %1404 = vrot.lane.b32.xlu1 %v1371_v14, %s3706_s10  ;;  %v4487_v14 = vld [vmem:[%s3793_s5 + $0xac] sm:$0xf]  ;;  %v620_v20 = vshll.u32 %v4521_v15, 16 }
  0xc6   : > { %1388 = vrot.lane.b32.xlu0 %v1347_v58, %s3706_s10  ;;  %v4512_v46 = vcombine.low %v250_v11, %v4487_v14  ;;  %v1629_v42 = vsel %vm544_vm1, %v1624_v25, %v1628_v18  ;;  %v4558_v25 = vld [vmem:[%s3793_s5 + $0xb8] sm:$0xf] }
  0xc7   : > { %v4482_v62 = vpop.permute.xlu1 %1780  ;;  %v4570_v18 = vld [vmem:[%s3793_s5 + $0x58] sm:$0xf] }
  0xc8   : > { %v4493_v58 = vpop.permute.xlu0 %1764  ;;  %v716_v6 = vshll.u32 %v4512_v46, 16 }
  0xc9   : > { %1514 = vrot.lane.b32.xlu1 %v4389_v41, %s3707_s13  ;;  %v2089_v41 = vsel %vm2087_vm8, %v2056_v50, %v4422_v53  ;;  %v4587_v50 = vcombine.low %v252_v22, %v4558_v25 }
  0xca   : > { %1498 = vrot.lane.b32.xlu0 %v4417_v48, %s3707_s13  ;;  %v1926_v48 = vsel %vm1922_vm3, %v3843_v38, %v4286_v52  ;;  %v2122_v4 = vsel %vm2120_vm9, %v2089_v41, %v1763_v36  ;;  %v1879_v38 = vrot.slane %v4420_v40, 1  ;;  %v1854_v52 = vrot.slane %v3276_v26, 1  ;;  %v4538_v36 = vld [vmem:[%s3793_s5 + $0x50] ss:$0 sps:$4 sm:$0x11]  }
  0xcb   : > { %v1907_v55 = vpop.permute.xlu1 %1906  ;;  %v2008_v40 = vsel %vm1988_vm5, %v1975_v47, %v4324_v29  ;;  %v1959_v26 = vsel %vm1955_vm4, %v1926_v48, %v4279_v59  ;;  %v714_v59 = vshrl.u32 %v4512_v46, 16  ;;  %v723_v48 = vrot.slane %v721_v43, 1  ;;  %v276_v43 = vld [vmem:[%s3793_s5 + $0x48] sm:$0xe] }
  0xcc   : > { %v1891_v3 = vpop.permute.xlu0 %1890  ;;  %v2171_v12 = vsel %vm2153_vm10, %v2138_v19, %v1907_v55  ;;  %v1992_v63 = vsel %vm1988_vm5, %v1959_v26, %v4328_v37  ;;  %v2041_v29 = vsel %vm2021_vm6, %v2008_v40, %v4356_v0  ;;  %v618_v37 = vshrl.u32 %v4521_v15, 16 }
  0xcd   : > { %1516 = vrot.lane.b32.xlu1 %v4425_v44, %s3707_s13  ;;  %v2155_v53 = vsel %vm2153_vm10, %v2122_v4, %v1891_v3  ;;  %3418 = vmatprep.mubr.msk.bf16.mxu1 %vm2206_vm11, %v2171_v12  ;;  %v1737_v44 = vsel %vm544_vm1, %v1732_v9, %v1736_v21  ;;  %v2025_v9 = vsel %vm2021_vm6, %v1992_v63, %v4362_v13  ;;  %v625_v0 = vshll.u32 %v4538_v36, 16  ;;  %v3141_v21 = vld [vmem:[%s3793_s5 + $0xb4] sm:$0xe]  ;;  %v4608_v4 = vld [vmem:[%s3793_s5 + $0xbc] ss:$0 sps:$4 sm:$0x11]  }
  0xce   : > { %1500 = vrot.lane.b32.xlu0 %v4430_v56, %s3707_s13  ;;  %3402 = vmatprep.mubr.msk.bf16.mxu0 %vm2206_vm11, %v2155_v53  ;;  %v1641_v56 = vsel %vm544_vm1, %v1636_v49, %v1640_v34  ;;  %v2074_v5 = vsel %vm2054_vm7, %v2041_v29, %v4385_v60  ;;  %v2058_v1 = vsel %vm2054_vm7, %v2025_v9, %v4391_v33  ;;  %v3133_v49 = vld [vmem:[%s3793_s5 + $0x54] sm:$0xe]  ;;  %v718_v13 = vrot.slane %v716_v6, 1 }
  0xcf   : > { %v4552_v24 = vpop.permute.xlu1 %757  ;;  %v2107_v57 = vsel %vm2087_vm8, %v2074_v5, %v4436_v7  ;;  %v2091_v60 = vsel %vm2087_vm8, %v2058_v1, %v4441_v61  ;;  %v622_v33 = vrot.slane %v620_v20, 1  ;;  %v4594_v34 = vcombine.low %v236_v39, %v4570_v18 }
  0xd0   : > { %v4564_v11 = vpop.permute.xlu0 %741  ;;  %v2124_v7 = vsel %vm2120_vm9, %v2091_v60, %v4493_v58  ;;  %v3285_v19 = vcombine.low %v3141_v21, %v4402_v10  ;;  %v3277_v61 = vcombine.low %v3133_v49, %v4410_v27  ;;  %v719_v58 = vor.u32 %v718_v13, %v714_v59  ;;  %v285_v13 = vld [vmem:[%s3793_s5 + $0xb4] sm:$0xe] }
  0xd1   : > { %1786 = vrot.lane.b32.xlu1 %v1725_v35, %s3708_s22  ;;  %v2140_v35 = vsel %vm2120_vm9, %v2107_v57, %v4482_v62  ;;  %v1880_v62 = vsel %vm817_vm0, %v1878_v31, %v1879_v38  ;;  %v728_v10 = vshll.u32 %v4587_v50, 16  ;;  %v1856_v27 = vsel %vm817_vm0, %v1854_v52, %v1855_v17 }
  0xd2   : > { %1770 = vrot.lane.b32.xlu0 %v1629_v42, %s3708_s22  ;;  %v623_v12 = vor.u32 %v622_v33, %v618_v37  ;;  %v627_v53 = vrot.slane %v625_v0, 1  ;;  %v4615_v42 = vld [vmem:[%s3793_s5 + $0x5c] ss:$0 sps:$4 sm:$0x11]   ;;  %v632_v47 = vshll.u32 %v4594_v34, 16  ;;  %v1881_v31 = vrot.slane %v3285_v19, 1 }
  0xd3   : > { %v1909_v45 = vpop.permute.xlu1 %1908  ;;  %v1882_v38 = vrot.slane %v4453_v2, 1  ;;  %v1857_v6 = vrot.slane %v3277_v61, 1  ;;  %v1858_v40 = vrot.slane %v4463_v8, 1  ;;  %v724_v52 = vsel %vm544_vm1, %v719_v58, %v723_v48  ;;  %v284_v8 = vld [vmem:[%s3793_s5 + $0xa8] sm:$0xe] }
  0xd4   : > { %v2173_v30 = vsel %vm2153_vm10, %v2140_v35, %v1909_v45  ;;  %v1893_v41 = vpop.permute.xlu0 %1892  ;;  %v726_v17 = vshrl.u32 %v4587_v50, 16  ;;  %v730_v26 = vrot.slane %v728_v10, 1  ;;  %v628_v22 = vsel %vm544_vm1, %v623_v12, %v627_v53  ;;  %v277_v35 = vld [vmem:[%s3793_s5 + $0x54] sm:$0xe] }
  0xd5   : > { %v2157_v55 = vsel %vm2153_vm10, %v2124_v7, %v1893_v41  ;;  %1788 = vrot.lane.b32.xlu1 %v1737_v44, %s3708_s22  ;;  %3419 = vmatmul.mubr.msk.bf16.vlgmr.msra.gmra.mrb[0].mxu1 %vm2206_vm11, %v2173_v30  ;;  %v630_v63 = vshrl.u32 %v4594_v34, 16  ;;  %v634_v29 = vrot.slane %v632_v47, 1  ;;  %v637_v2 = vshll.u32 %v4615_v42, 16  ;;  %v3028_v48 = vld [vmem:[%s3793_s5 + $0x54] sm:$0xf] }
  0xd6   : > { %1772 = vrot.lane.b32.xlu0 %v1641_v56, %s3708_s22  ;;  %3403 = vmatmul.mubr.msk.bf16.vlgmr.msra.gmra.mrb[0].mxu0 %vm2206_vm11, %v2157_v55  ;;  %v733_v56 = vshll.u32 %v4608_v4, 16  ;;  %v1883_v39 = vsel %vm817_vm0, %v1881_v31, %v1882_v38  ;;  %v731_v9 = vor.u32 %v730_v26, %v726_v17  ;;  %v3190_v37 = vcombine.low %v284_v8, %v4487_v14  ;;  %v3044_v55 = vld [vmem:[%s3793_s5 + $0xb4] sm:$0xf]  ;;  %v3046_v38 = vld [vmem:[%s3793_s5 + $0xc0] sm:$0xf] }
  0xd7   : > { %v4611_v3 = vpop.permute.xlu1 %759  ;;  %v1859_v1 = vsel %vm817_vm0, %v1857_v6, %v1858_v40  ;;  %v635_v57 = vor.u32 %v634_v29, %v630_v63  ;;  %v639_v21 = vrot.slane %v637_v2, 1  ;;  %v3182_v49 = vcombine.low %v276_v43, %v4497_v23  ;;  %v4680_v6 = vld [vmem:[%s3793_s5 + $0xc4] sm:$0xf] }
  0xd8   : > { %v4618_v44 = vpop.permute.xlu0 %743  ;;  %v735_v5 = vrot.slane %v733_v56, 1  ;;  %v860_v45 = vrot.slane %v3190_v37, 1  ;;  %v861_v33 = vrot.slane %v4529_v16, 1  ;;  %v3191_v7 = vcombine.low %v285_v13, %v4558_v25  ;;  %v4666_v16 = vld [vmem:[%s3793_s5 + $0x58] sm:$0xf] }
  0xd9   : > { %1914 = vrot.lane.b32.xlu1 %v1880_v62, %s3709_s23  ;;  %v640_v23 = vsel %vm544_vm1, %v635_v57, %v639_v21  ;;  %v836_v41 = vrot.slane %v3182_v49, 1  ;;  %v837_v19 = vrot.slane %v4538_v36, 1  ;;  %v3183_v61 = vcombine.low %v277_v35, %v4570_v18  ;;  %v4660_v62 = vld [vmem:[%s3793_s5 + $0xb8] sm:$0xf]  ;;  %v4686_v17 = vld [vmem:[%s3793_s5 + $0x64] sm:$0xf] }
  0xda   : > { %1898 = vrot.lane.b32.xlu0 %v1856_v27, %s3709_s23  ;;  %v736_v14 = vsel %vm544_vm1, %v731_v9, %v735_v5  ;;  %v862_v36 = vsel %vm817_vm0, %v860_v45, %v861_v33  ;;  %v863_v25 = vrot.slane %v3191_v7, 1  ;;  %v864_v18 = vrot.slane %v4608_v4, 1  ;;  %v4690_v4 = vld [vmem:[%s3793_s5 + $0xbc] ss:$0 sps:$4 sm:$0x11]  }
  0xdb   : > { %v4627_v20 = vpop.permute.xlu1 %886  ;;  %v3206_v10 = vcombine.low %v3044_v55, %v4660_v62  ;;  %v838_v12 = vsel %vm817_vm0, %v836_v41, %v837_v19  ;;  %v839_v53 = vrot.slane %v3183_v61, 1  ;;  %v840_v47 = vrot.slane %v4615_v42, 1  ;;  %v4714_v35 = vld [vmem:[%s3793_s5 + $0x68] ss:$0 sps:$4 sm:$0x11]  }
  0xdc   : > { %v4633_v59 = vpop.permute.xlu0 %870  ;;  %v3198_v31 = vcombine.low %v3028_v48, %v4666_v16  ;;  %v865_v26 = vsel %vm817_vm0, %v863_v25, %v864_v18  ;;  %v3207_v42 = vcombine.low %v3046_v38, %v4680_v6  ;;  %v1234_v9 = vshll.u32 %v4690_v4, 16 }
  0xdd   : > { %765 = vrot.lane.b32.xlu1 %v724_v52, %s3704_s8  ;;  %v3030_v52 = vld [vmem:[%s3793_s5 + $0x60] sm:$0xf]  ;;  %v1229_v56 = vshll.u32 %v3206_v10, 16  ;;  %v841_v29 = vsel %vm817_vm0, %v839_v53, %v840_v47  ;;  %v1150_v18 = vshll.u32 %v4714_v35, 16  ;;  %v3070_v53 = vld [vmem:[%s3793_s5 + $0x54] sm:$0xe] }
  0xde   : > { %749 = vrot.lane.b32.xlu0 %v628_v22, %s3704_s8  ;;  %v4696_v22 = vld [vmem:[%s3793_s5 + $0x5c] ss:$0 sps:$4 sm:$0x11]   ;;  %v3199_v2 = vcombine.low %v3030_v52, %v4686_v17  ;;  %v1133_v8 = vshll.u32 %v3198_v31, 16  ;;  %v1241_v57 = vshll.u32 %v3207_v42, 16  ;;  %v1131_v49 = vshrl.u32 %v3198_v31, 16 }
  0xdf   : > { %v4640_v0 = vpop.permute.xlu1 %888  ;;  %v1231_v5 = vrot.slane %v1229_v56, 1  ;;  %v1138_v37 = vshll.u32 %v4696_v22, 16  ;;  %v1236_v33 = vrot.slane %v1234_v9, 1  ;;  %v1239_v7 = vshrl.u32 %v3207_v42, 16 }
  0xe0   : > { %v4645_v60 = vpop.permute.xlu0 %872  ;;  %v1135_v13 = vrot.slane %v1133_v8, 1  ;;  %v1243_v19 = vrot.slane %v1241_v57, 1  ;;  %v1152_v8 = vrot.slane %v1150_v18, 1 }
  0xe1   : > { %1916 = vrot.lane.b32.xlu1 %v1883_v39, %s3709_s23  ;;  %v1227_v39 = vshrl.u32 %v3206_v10, 16  ;;  %v1140_v41 = vrot.slane %v1138_v37, 1  ;;  %v4743_v37 = vld [vmem:[%s3793_s5 + $0xc4] sm:$0xf] }
  0xe2   : > { %1900 = vrot.lane.b32.xlu0 %v1859_v1, %s3709_s23  ;;  %v4709_v1 = vld [vmem:[%s3793_s5 + $0xc8] ss:$0 sps:$4 sm:$0x11]   ;;  %v1136_v48 = vor.u32 %v1135_v13, %v1131_v49  ;;  %v1373_v49 = vrot.slane %v4690_v4, 1  ;;  %v3092_v13 = vld [vmem:[%s3793_s5 + $0x60] sm:$0xf] }
  0xe3   : > { %v4653_v30 = vpop.permute.xlu1 %998  ;;  %v1246_v61 = vshll.u32 %v4709_v1, 16  ;;  %v3110_v4 = vld [vmem:[%s3793_s5 + $0xcc] sm:$0xf]  ;;  %v1376_v18 = vrot.slane %v4709_v1, 1 }
  0xe4   : > { %v4662_v58 = vpop.permute.xlu0 %982  ;;  %v1141_v56 = vsel %vm544_vm1, %v1136_v48, %v1140_v41  ;;  %v1349_v41 = vrot.slane %v4696_v22, 1 }
  0xe5   : > { %767 = vrot.lane.b32.xlu1 %v736_v14, %s3704_s8  ;;  %v1145_v14 = vshll.u32 %v3199_v2, 16  ;;  %v1248_v38 = vrot.slane %v1246_v61, 1 }
  0xe6   : > { %751 = vrot.lane.b32.xlu0 %v640_v23, %s3704_s8  ;;  %v1232_v23 = vor.u32 %v1231_v5, %v1227_v39  ;;  %v3230_v39 = vcombine.low %v3070_v53, %v4666_v16  ;;  %v3108_v5 = vld [vmem:[%s3793_s5 + $0xc0] sm:$0xf]  ;;  %s3710_s8 = smov 120  }
  0xe7   : > { %v4673_v27 = vpop.permute.xlu1 %1000  ;;  %v1147_v25 = vrot.slane %v1145_v14, 1  ;;  %v4751_v14 = vld [vmem:[%s3793_s5 + $0x64] sm:$0xf]  ;;  %v3254_v48 = vcombine.low %v3108_v5, %v4743_v37 }
  0xe8   : > { %v4682_v40 = vpop.permute.xlu0 %984  ;;  %v1237_v47 = vsel %vm544_vm1, %v1232_v23, %v1236_v33  ;;  %v1348_v23 = vrot.slane %v3230_v39, 1 }
  0xe9   : > { %894 = vrot.lane.b32.xlu1 %v862_v36, %s3703_s7  ;;  %v1143_v36 = vshrl.u32 %v3199_v2, 16  ;;  %v1741_v39 = vshll.u32 %v3254_v48, 16 }
  0xea   : > { %878 = vrot.lane.b32.xlu0 %v838_v12, %s3703_s7  ;;  %v3078_v12 = vld [vmem:[%s3793_s5 + $0xb4] sm:$0xe]  ;;  %v1350_v53 = vsel %vm817_vm0, %v1348_v23, %v1349_v41  ;;  %v1944_v41 = vsel %vm1922_vm3, %v3981_v51, %v4552_v24 }
  0xeb   : > { %v4698_v63 = vpop.permute.xlu1 %1270  ;;  %v3238_v52 = vcombine.low %v3078_v12, %v4660_v62 }
  0xec   : > { %v4702_v43 = vpop.permute.xlu0 %1254 }
  0xed   : > { %896 = vrot.lane.b32.xlu1 %v865_v26, %s3703_s7  ;;  %v1372_v57 = vrot.slane %v3238_v52, 1 }
  0xee   : > { %880 = vrot.lane.b32.xlu0 %v841_v29, %s3703_s7  ;;  %v1148_v29 = vor.u32 %v1147_v25, %v1143_v36  ;;  %v4765_v36 = vld [vmem:[%s3793_s5 + $0xd0] sm:$0xf]  ;;  %v4768_v25 = vld [vmem:[%s3793_s5 + $0xc8] ss:$0 sps:$4 sm:$0x11]   ;;  %s5008_s7 = scalar_lea.vmem %s5406_s2, %s3343_s30  ;;  %s3711_s30 = smov [#allocation2]  }
  0xef   : > { %v4711_v21 = vpop.permute.xlu1 %1272  ;;  %v1746_v1 = vshll.u32 %v4768_v25, 16 }
  0xf0   : > { %v4716_v45 = vpop.permute.xlu0 %1256 }
  0xf1   : > { %1006 = vrot.lane.b32.xlu1 %v3206_v10, %s3702_s6 }
  0xf2   : > { %990 = vrot.lane.b32.xlu0 %v3198_v31, %s3702_s6  ;;  %v1244_v31 = vor.u32 %v1243_v19, %v1239_v7  ;;  %v1153_v7 = vsel %vm544_vm1, %v1148_v29, %v1152_v8  ;;  %v3094_v29 = vld [vmem:[%s3793_s5 + $0x6c] sm:$0xf]  ;;  %v4787_v8 = vld [vmem:[%s3793_s5 + $0x70] sm:$0xf] }
  0xf3   : > { %v4721_v55 = vpop.permute.xlu1 %1398 }
  0xf4   : > { %v4725_v10 = vpop.permute.xlu0 %1382  ;;  %v1249_v62 = vsel %vm544_vm1, %v1244_v31, %v1248_v38  ;;  %v1352_v31 = vrot.slane %v4714_v35, 1  ;;  %v4778_v38 = vld [vmem:[%s3793_s5 + $0x68] ss:$0 sps:$4 sm:$0x11]  }
  0xf5   : > { %1008 = vrot.lane.b32.xlu1 %v3207_v42, %s3702_s6  ;;  %v3079_v42 = vld [vmem:[%s3793_s5 + $0xc0] sm:$0xe] }
  0xf6   : > { %992 = vrot.lane.b32.xlu0 %v3199_v2, %s3702_s6  ;;  %v3071_v2 = vld [vmem:[%s3793_s5 + $0x60] sm:$0xe]  ;;  %v3239_v16 = vcombine.low %v3079_v42, %v4680_v6  ;;  %v3246_v6 = vcombine.low %v3092_v13, %v4751_v14  ;;  %v1739_v13 = vshrl.u32 %v3254_v48, 16 }
  0xf7   : > { %v4732_v26 = vpop.permute.xlu1 %1400  ;;  %v3231_v19 = vcombine.low %v3071_v2, %v4686_v17  ;;  %v1374_v17 = vsel %vm817_vm0, %v1372_v57, %v1373_v49  ;;  %v4794_v2 = vld [vmem:[%s3793_s5 + $0xd4] ss:$0 sps:$4 sm:$0x11]   ;;  %v4798_v57 = vcombine.low %v3094_v29, %v4787_v8  ;;  %v1650_v49 = vshll.u32 %v4778_v38, 16 }
  0xf8   : > { %v4737_v9 = vpop.permute.xlu0 %1384  ;;  %v1375_v22 = vrot.slane %v3239_v16, 1  ;;  %v1645_v42 = vshll.u32 %v3246_v6, 16 }
  0xf9   : > { %1278 = vrot.lane.b32.xlu1 %v1237_v47, %s3705_s9  ;;  %v1351_v47 = vrot.slane %v3231_v19, 1  ;;  %v1748_v19 = vrot.slane %v1746_v1, 1 }
  0xfa   : > { %1262 = vrot.lane.b32.xlu0 %v1141_v56, %s3705_s9  ;;  %v4783_v56 = vcombine.low %v3110_v4, %v4765_v36  ;;  %v1377_v35 = vsel %vm817_vm0, %v1375_v22, %v1376_v18  ;;  %v1643_v4 = vshrl.u32 %v3246_v6, 16  ;;  %v1928_v22 = vsel %vm1922_vm3, %v3984_v54, %v4564_v11 }
  0xfb   : > { %v4753_v33 = vpop.permute.xlu1 %1510  ;;  %v1977_v18 = vsel %vm1955_vm4, %v1944_v41, %v4627_v20  ;;  %v1961_v51 = vsel %vm1955_vm4, %v1928_v22, %v4633_v59  ;;  %v1652_v54 = vrot.slane %v1650_v49, 1  ;;  %v1657_v11 = vshll.u32 %v4798_v57, 16 }
  0xfc   : > { %v4758_v61 = vpop.permute.xlu0 %1494  ;;  %v1753_v23 = vshll.u32 %v4783_v56, 16  ;;  %v2010_v24 = vsel %vm1988_vm5, %v1977_v18, %v4653_v30  ;;  %v1994_v20 = vsel %vm1988_vm5, %v1961_v51, %v4662_v58  ;;  %v1655_v49 = vshrl.u32 %v4798_v57, 16 }
  0xfd   : > { %1280 = vrot.lane.b32.xlu1 %v1249_v62, %s3705_s9  ;;  %v1353_v62 = vsel %vm817_vm0, %v1351_v47, %v1352_v31  ;;  %v1758_v47 = vshll.u32 %v4794_v2, 16  ;;  %v4815_v31 = vld [vmem:[%s3793_s5 + $0x74] ss:$0 sps:$4 sm:$0x11]   ;;  %v2027_v59 = vsel %vm2021_vm6, %v1994_v20, %v4702_v43 }
  0xfe   : > { %1264 = vrot.lane.b32.xlu0 %v1153_v7, %s3705_s9  ;;  %v1743_v7 = vrot.slane %v1741_v39, 1  ;;  %v2043_v39 = vsel %vm2021_vm6, %v2010_v24, %v4698_v63  ;;  %v2060_v58 = vsel %vm2054_vm7, %v2027_v59, %v4725_v10  ;;  %v1662_v43 = vshll.u32 %v4815_v31, 16  ;;  %v3135_v24 = vld [vmem:[%s3793_s5 + $0x6c] sm:$0xe] }
  0xff   : > { %v4773_v12 = vpop.permute.xlu1 %1512  ;;  %v2076_v30 = vsel %vm2054_vm7, %v2043_v39, %v4721_v55  ;;  %v1946_v55 = vsel %vm1922_vm3, %v4022_v28, %v4611_v3  ;;  %v1659_v10 = vrot.slane %v1657_v11, 1 }
 0x100   : > { %v4780_v52 = vpop.permute.xlu0 %1496  ;;  %v2109_v63 = vsel %vm2087_vm8, %v2076_v30, %v4753_v33 }
 0x101   : > { %1406 = vrot.lane.b32.xlu1 %v1374_v17, %s3706_s10  ;;  %v1647_v17 = vrot.slane %v1645_v42, 1  ;;  %v1744_v42 = vor.u32 %v1743_v7, %v1739_v13  ;;  %v1760_v13 = vrot.slane %v1758_v47, 1  ;;  %v3142_v7 = vld [vmem:[%s3793_s5 + $0xc0] sm:$0xe] }
 0x102   : > { %1390 = vrot.lane.b32.xlu0 %v1350_v53, %s3706_s10  ;;  %v1751_v53 = vshrl.u32 %v4783_v56, 16  ;;  %v3286_v3 = vcombine.low %v3142_v7, %v4743_v37 }
 0x103   : > { %v1783_v5 = vpop.permute.xlu1 %1782  ;;  %v1749_v22 = vsel %vm544_vm1, %v1744_v42, %v1748_v19 }
 0x104   : > { %v1767_v16 = vpop.permute.xlu0 %1766  ;;  %v1884_v11 = vrot.slane %v3286_v3, 1 }
 0x105   : > { %1408 = vrot.lane.b32.xlu1 %v1377_v35, %s3706_s10  ;;  %v1755_v35 = vrot.slane %v1753_v23, 1  ;;  %v2142_v23 = vsel %vm2120_vm9, %v2109_v63, %v1783_v5  ;;  %v1979_v5 = vsel %vm1955_vm4, %v1946_v55, %v4640_v0 }
 0x106   : > { %1392 = vrot.lane.b32.xlu0 %v1353_v62, %s3706_s10  ;;  %v1648_v62 = vor.u32 %v1647_v17, %v1643_v4  ;;  %v3134_v4 = vld [vmem:[%s3793_s5 + $0x60] sm:$0xe]  ;;  %v2012_v37 = vsel %vm1988_vm5, %v1979_v5, %v4673_v27 }
 0x107   : > { %v4821_v29 = vpop.permute.xlu1 %1784  ;;  %v1756_v18 = vor.u32 %v1755_v35, %v1751_v53  ;;  %v3143_v53 = vld [vmem:[%s3793_s5 + $0xcc] sm:$0xe]  ;;  %v3279_v35 = vcombine.low %v3135_v24, %v4787_v8  ;;  %v1888_v8 = vrot.slane %v4794_v2, 1  ;;  %s3642_s5 = sshll.u32 %s3711_s30, 4  ;;  %s3643_s5 = int_to_ptr.vmem [resolvable:$false] %s3642_s5 }
 0x108   : > { %v4828_v1 = vpop.permute.xlu0 %1768  ;;  %v1653_v28 = vsel %vm544_vm1, %v1648_v62, %v1652_v54  ;;  %v3287_v39 = vcombine.low %v3143_v53, %v4765_v36  ;;  %s3644_s6 = scalar_lea.vmem %s3643_s5, 64  ;;  %p3645_p0 = scmp.lt.s32.totalorder %s5334_s20, %s3643_s5 }
 0x109   : > { %1518 = vrot.lane.b32.xlu1 %v3254_v48, %s3707_s13  ;;  %v2093_v48 = vsel %vm2087_vm8, %v2060_v58, %v4758_v61  ;;  %v1930_v61 = vsel %vm1922_vm3, %v4027_v32, %v4618_v44  ;;  %v1660_v32 = vor.u32 %v1659_v10, %v1655_v49  ;;  %v1664_v44 = vrot.slane %v1662_v43, 1  ;;  %p3646_p1 = scmp.lt.s32.totalorder %s3644_s6, %s3638_s29 }
 0x10a   : > { %1502 = vrot.lane.b32.xlu0 %v3246_v6, %s3707_s13  ;;  %v2126_v33 = vsel %vm2120_vm9, %v2093_v48, %v1767_v16  ;;  %v1963_v16 = vsel %vm1955_vm4, %v1930_v61, %v4645_v60  ;;  %v1885_v60 = vrot.slane %v4768_v25, 1  ;;  %v1863_v62 = vrot.slane %v3279_v35, 1 }
 0x10b   : > { %v1911_v41 = vpop.permute.xlu1 %1910  ;;  %v1996_v0 = vsel %vm1988_vm5, %v1963_v16, %v4682_v40  ;;  %v1861_v40 = vrot.slane %v4778_v38, 1  ;;  %v1665_v38 = vsel %vm544_vm1, %v1660_v32, %v1664_v44  ;;  %v1864_v49 = vrot.slane %v4815_v31, 1  ;;  %v5420_v44 = vld [vmem:[#allocation6_spill] sm:$0xff]  ;;  %p3647_p2 = por %p3646_p1, %p3645_p0 }
 0x10c   : > { %v2175_v6 = vsel %vm2153_vm10, %v2142_v23, %v1911_v41  ;;  %v1895_v17 = vpop.permute.xlu0 %1894  ;;  %v2029_v27 = vsel %vm2021_vm6, %v1996_v0, %v4716_v45  ;;  %v1886_v36 = vsel %vm817_vm0, %v1884_v11, %v1885_v60 }
 0x10d   : > { %v2159_v47 = vsel %vm2153_vm10, %v2126_v33, %v1895_v17  ;;  %1520 = vrot.lane.b32.xlu1 %v4783_v56, %s3707_s13  ;;  %3422 = vmatprep.mubr.msk.bf16.mxu1 %vm2206_vm11, %v2175_v6  ;;  %v3278_v56 = vcombine.low %v3134_v4, %v4751_v14  ;;  %v1761_v14 = vsel %vm544_vm1, %v1756_v18, %v1760_v13  ;;  %p3648_p3 = pnand %p3647_p2, %p3641_p13 }
 0x10e   : > { %1504 = vrot.lane.b32.xlu0 %v4798_v57, %s3707_s13  ;;  %3406 = vmatprep.mubr.msk.bf16.mxu0 %vm2206_vm11, %v2159_v47  ;;  %v2045_v57 = vsel %vm2021_vm6, %v2012_v37, %v4711_v21  ;;  %v2062_v21 = vsel %vm2054_vm7, %v2029_v27, %v4737_v9  ;;  %v1865_v43 = vsel %vm817_vm0, %v1863_v62, %v1864_v49  ;;  %v5419_v37 = vld [vmem:[#allocation5_spill] sm:$0xff]  ;;  %s3340_s13 = sshll.u32 %s3758_s19, 5  ;;  %s2878_s19 = scalar_lea.sflag [#allocation3], %s203_s27 }
 0x10f   : > { %v4872_v19 = vpop.permute.xlu1 %761  ;;  %v2078_v54 = vsel %vm2054_vm7, %v2045_v57, %v4732_v26  ;;  %v1860_v25 = vrot.slane %v3278_v56, 1  ;;  %v2095_v45 = vsel %vm2087_vm8, %v2062_v21, %v4780_v52  ;;  %v1887_v52 = vrot.slane %v3287_v39, 1  ;;  %v5421_v21 = vld [vmem:[#allocation7_spill] sm:$0xff]  ;;  %s5332_s28 = scalar_lea.hbm %s5408_s4, %s3340_s13 }
 0x110   : > { %v4879_v51 = vpop.permute.xlu0 %745  ;;  %v2111_v20 = vsel %vm2087_vm8, %v2078_v54, %v4773_v12  ;;  %v2128_v9 = vsel %vm2120_vm9, %v2095_v45, %v4828_v1  ;;  %v1948_v32 = vsel %vm1922_vm3, %v5419_v37, %v4872_v19 }
 0x111   : > { %1790 = vrot.lane.b32.xlu1 %v1749_v22, %s3708_s22  ;;  %v2144_v26 = vsel %vm2120_vm9, %v2111_v20, %v4821_v29  ;;  %v1862_v1 = vsel %vm817_vm0, %v1860_v25, %v1861_v40  ;;  %v1889_v63 = vsel %vm817_vm0, %v1887_v52, %v1888_v8  ;;  %v1932_v53 = vsel %vm1922_vm3, %v5420_v44, %v4879_v51 }
 0x112   : > { %1774 = vrot.lane.b32.xlu0 %v1653_v28, %s3708_s22 }
 0x113   : > { %v1913_v42 = vpop.permute.xlu1 %1912 }
 0x114   : > { %v2177_v12 = vsel %vm2153_vm10, %v2144_v26, %v1913_v42  ;;  %v1897_v59 = vpop.permute.xlu0 %1896 }
 0x115   : > { %v2161_v30 = vsel %vm2153_vm10, %v2128_v9, %v1897_v59  ;;  %1792 = vrot.lane.b32.xlu1 %v1761_v14, %s3708_s22  ;;  %3423 = vmatmul.mubr.msk.bf16.gmra.mrb[4].mxu1 %vm2206_vm11, %v2177_v12  ;;  %v5422_v9 = vld [vmem:[#allocation8_spill] sm:$0xff] }
 0x116   : > { %1776 = vrot.lane.b32.xlu0 %v1665_v38, %s3708_s22  ;;  %3407 = vmatmul.mubr.msk.bf16.gmra.mrb[4].mxu0 %vm2206_vm11, %v2161_v30 }
 0x117   : > { %v764_v29 = vpop.permute.xlu1 %763 }
 0x118   : > { %v748_v58 = vpop.permute.xlu0 %747  ;;  %v1950_v20 = vsel %vm1922_vm3, %v5421_v21, %v764_v29 }
 0x119   : > { %1918 = vrot.lane.b32.xlu1 %v1886_v36, %s3709_s23  ;;  %v1934_v12 = vsel %vm1922_vm3, %v5422_v9, %v748_v58 }
 0x11a   : > { %1902 = vrot.lane.b32.xlu0 %v1862_v1, %s3709_s23 }
 0x11b   : > { %v891_v13 = vpop.permute.xlu1 %890 }
 0x11c   : > { %v875_v7 = vpop.permute.xlu0 %874  ;;  %v1981_v0 = vsel %vm1955_vm4, %v1948_v32, %v891_v13 }
 0x11d   : > { %1920 = vrot.lane.b32.xlu1 %v1889_v63, %s3709_s23  ;;  %v1965_v57 = vsel %vm1955_vm4, %v1932_v53, %v875_v7 }
 0x11e   : > { %1904 = vrot.lane.b32.xlu0 %v1865_v43, %s3709_s23 }
 0x11f   : > { %v893_v2 = vpop.permute.xlu1 %892 }
 0x120   : > { %v877_v55 = vpop.permute.xlu0 %876  ;;  %v1983_v59 = vsel %vm1955_vm4, %v1950_v20, %v893_v2 }
 0x121   : > { %v1967_v30 = vsel %vm1955_vm4, %v1934_v12, %v877_v55 }
 0x123   : > { %v1003_v48 = vpop.permute.xlu1 %1002 }
 0x124   : > { %v987_v23 = vpop.permute.xlu0 %986  ;;  %v2014_v14 = vsel %vm1988_vm5, %v1981_v0, %v1003_v48 }
 0x125   : > { %v1998_v24 = vsel %vm1988_vm5, %v1965_v57, %v987_v23 }
 0x127   : > { %v1005_v31 = vpop.permute.xlu1 %1004 }
 0x128   : > { %v989_v41 = vpop.permute.xlu0 %988  ;;  %v2016_v36 = vsel %vm1988_vm5, %v1983_v59, %v1005_v31 }
 0x129   : > { %v2000_v8 = vsel %vm1988_vm5, %v1967_v30, %v989_v41 }
 0x12b   : > { %v1275_v10 = vpop.permute.xlu1 %1274 }
 0x12c   : > { %v1259_v4 = vpop.permute.xlu0 %1258  ;;  %v2047_v27 = vsel %vm2021_vm6, %v2014_v14, %v1275_v10 }
 0x12d   : > { %v2031_v11 = vsel %vm2021_vm6, %v1998_v24, %v1259_v4 }
 0x12f   : > { %v1277_v33 = vpop.permute.xlu1 %1276 }
 0x130   : > { %v1261_v6 = vpop.permute.xlu0 %1260  ;;  %v2049_v29 = vsel %vm2021_vm6, %v2016_v36, %v1277_v33 }
 0x131   : > { %v2033_v62 = vsel %vm2021_vm6, %v2000_v8, %v1261_v6 }
 0x133   : > { %v1403_v17 = vpop.permute.xlu1 %1402 }
 0x134   : > { %v1387_v22 = vpop.permute.xlu0 %1386  ;;  %v2080_v19 = vsel %vm2054_vm7, %v2047_v27, %v1403_v17 }
 0x135   : > { %v2064_v40 = vsel %vm2054_vm7, %v2031_v11, %v1387_v22 }
 0x137   : > { %v1405_v18 = vpop.permute.xlu1 %1404 }
 0x138   : > { %v1389_v47 = vpop.permute.xlu0 %1388  ;;  %v2082_v49 = vsel %vm2054_vm7, %v2049_v29, %v1405_v18 }
 0x139   : > { %v2066_v58 = vsel %vm2054_vm7, %v2033_v62, %v1389_v47 }
 0x13b   : > { %v1515_v28 = vpop.permute.xlu1 %1514 }
 0x13c   : > { %v1499_v3 = vpop.permute.xlu0 %1498  ;;  %v2113_v51 = vsel %vm2087_vm8, %v2080_v19, %v1515_v28 }
 0x13d   : > { %v2097_v25 = vsel %vm2087_vm8, %v2064_v40, %v1499_v3 }
 0x13f   : > { %v1517_v61 = vpop.permute.xlu1 %1516 }
 0x140   : > { %v1501_v5 = vpop.permute.xlu0 %1500  ;;  %v2115_v63 = vsel %vm2087_vm8, %v2082_v49, %v1517_v61 }
 0x141   : > { %v2099_v13 = vsel %vm2087_vm8, %v2066_v58, %v1501_v5 }
 0x143   : > { %v1787_v56 = vpop.permute.xlu1 %1786 }
 0x144   : > { %v1771_v16 = vpop.permute.xlu0 %1770  ;;  %v2146_v39 = vsel %vm2120_vm9, %v2113_v51, %v1787_v56 }
 0x145   : > { %v2130_v26 = vsel %vm2120_vm9, %v2097_v25, %v1771_v16 }
 0x147   : > { %v1789_v60 = vpop.permute.xlu1 %1788 }
 0x148   : > { %v1773_v54 = vpop.permute.xlu0 %1772  ;;  %v2148_v43 = vsel %vm2120_vm9, %v2115_v63, %v1789_v60 }
 0x149   : > { %v2132_v2 = vsel %vm2120_vm9, %v2099_v13, %v1773_v54 }
 0x14b   : > { %v1915_v45 = vpop.permute.xlu1 %1914 }
 0x14c   : > { %v2179_v42 = vsel %vm2153_vm10, %v2146_v39, %v1915_v45  ;;  %v1899_v38 = vpop.permute.xlu0 %1898 }
 0x14d   : > { %v2163_v35 = vsel %vm2153_vm10, %v2130_v26, %v1899_v38  ;;  %3426 = vmatprep.mubr.msk.bf16.mxu1 %vm2206_vm11, %v2179_v42 }
 0x14e   : > { %3410 = vmatprep.mubr.msk.bf16.mxu0 %vm2206_vm11, %v2163_v35 }
 0x14f   : > { %v766_v52 = vpop.permute.xlu1 %765 }
 0x150   : > { %v750_v1 = vpop.permute.xlu0 %749  ;;  %v1952_v24 = vsel %vm1922_vm3, %v4512_v46, %v766_v52 }
 0x151   : > { %v1936_v27 = vsel %vm1922_vm3, %v4521_v15, %v750_v1 }
 0x153   : > { %v1917_v7 = vpop.permute.xlu1 %1916 }
 0x154   : > { %v2181_v55 = vsel %vm2153_vm10, %v2148_v43, %v1917_v7  ;;  %v1901_v48 = vpop.permute.xlu0 %1900 }
 0x155   : > { %v2165_v23 = vsel %vm2153_vm10, %v2132_v2, %v1901_v48  ;;  %3427 = vmatmul.mubr.msk.bf16.gmra.mrb[8].mxu1 %vm2206_vm11, %v2181_v55 }
 0x156   : > { %3411 = vmatmul.mubr.msk.bf16.gmra.mrb[8].mxu0 %vm2206_vm11, %v2165_v23 }
 0x157   : > { %v768_v31 = vpop.permute.xlu1 %767 }
 0x158   : > { %v752_v41 = vpop.permute.xlu0 %751  ;;  %v1954_v11 = vsel %vm1922_vm3, %v4587_v50, %v768_v31 }
 0x159   : > { %v1938_v15 = vsel %vm1922_vm3, %v4594_v34, %v752_v41 }
 0x15b   : > { %v895_v10 = vpop.permute.xlu1 %894 }
 0x15c   : > { %v879_v4 = vpop.permute.xlu0 %878  ;;  %v1985_v54 = vsel %vm1955_vm4, %v1952_v24, %v895_v10 }
 0x15d   : > { %v1969_v19 = vsel %vm1955_vm4, %v1936_v27, %v879_v4 }
 0x15f   : > { %v897_v33 = vpop.permute.xlu1 %896 }
 0x160   : > { %v881_v6 = vpop.permute.xlu0 %880  ;;  %v1987_v45 = vsel %vm1955_vm4, %v1954_v11, %v897_v33 }
 0x161   : > { %v1971_v42 = vsel %vm1955_vm4, %v1938_v15, %v881_v6 }
 0x163   : > { %v1007_v17 = vpop.permute.xlu1 %1006 }
 0x164   : > { %v991_v22 = vpop.permute.xlu0 %990  ;;  %v2018_v40 = vsel %vm1988_vm5, %v1985_v54, %v1007_v17 }
 0x165   : > { %v2002_v21 = vsel %vm1988_vm5, %v1969_v19, %v991_v22 }
 0x167   : > { %v1009_v18 = vpop.permute.xlu1 %1008 }
 0x168   : > { %v993_v47 = vpop.permute.xlu0 %992  ;;  %v2020_v38 = vsel %vm1988_vm5, %v1987_v45, %v1009_v18 }
 0x169   : > { %v2004_v59 = vsel %vm1988_vm5, %v1971_v42, %v993_v47 }
 0x16b   : > { %v1279_v28 = vpop.permute.xlu1 %1278 }
 0x16c   : > { %v1263_v3 = vpop.permute.xlu0 %1262  ;;  %v2051_v20 = vsel %vm2021_vm6, %v2018_v40, %v1279_v28 }
 0x16d   : > { %v2035_v46 = vsel %vm2021_vm6, %v2002_v21, %v1263_v3 }
 0x16f   : > { %v1281_v61 = vpop.permute.xlu1 %1280 }
 0x170   : > { %v1265_v5 = vpop.permute.xlu0 %1264  ;;  %v2053_v30 = vsel %vm2021_vm6, %v2020_v38, %v1281_v61 }
 0x171   : > { %v2037_v8 = vsel %vm2021_vm6, %v2004_v59, %v1265_v5 }
 0x173   : > { %v1407_v56 = vpop.permute.xlu1 %1406 }
 0x174   : > { %v1391_v16 = vpop.permute.xlu0 %1390  ;;  %v2084_v39 = vsel %vm2054_vm7, %v2051_v20, %v1407_v56 }
 0x175   : > { %v2068_v50 = vsel %vm2054_vm7, %v2035_v46, %v1391_v16 }
 0x177   : > { %v1409_v37 = vpop.permute.xlu1 %1408 }
 0x178   : > { %v1393_v32 = vpop.permute.xlu0 %1392  ;;  %v2086_v29 = vsel %vm2054_vm7, %v2053_v30, %v1409_v37 }
 0x179   : > { %v2070_v62 = vsel %vm2054_vm7, %v2037_v8, %v1393_v32 }
 0x17b   : > { %v1519_v44 = vpop.permute.xlu1 %1518 }
 0x17c   : > { %v1503_v53 = vpop.permute.xlu0 %1502  ;;  %v2117_v26 = vsel %vm2087_vm8, %v2084_v39, %v1519_v44 }
 0x17d   : > { %v2101_v35 = vsel %vm2087_vm8, %v2068_v50, %v1503_v53 }
 0x17f   : > { %v1521_v0 = vpop.permute.xlu1 %1520 }
 0x180   : > { %v1505_v57 = vpop.permute.xlu0 %1504  ;;  %v2119_v49 = vsel %vm2087_vm8, %v2086_v29, %v1521_v0 }
 0x181   : > { %v2103_v58 = vsel %vm2087_vm8, %v2070_v62, %v1505_v57 }
 0x183   : > { %v1791_v14 = vpop.permute.xlu1 %1790 }
 0x184   : > { %v1775_v60 = vpop.permute.xlu0 %1774  ;;  %v2150_v9 = vsel %vm2120_vm9, %v2117_v26, %v1791_v14 }
 0x185   : > { %v2134_v34 = vsel %vm2120_vm9, %v2101_v35, %v1775_v60 }
 0x187   : > { %v1793_v51 = vpop.permute.xlu1 %1792 }
 0x188   : > { %v1777_v25 = vpop.permute.xlu0 %1776  ;;  %v2152_v63 = vsel %vm2120_vm9, %v2119_v49, %v1793_v51 }
 0x189   : > { %v2136_v43 = vsel %vm2120_vm9, %v2103_v58, %v1777_v25 }
 0x18b   : > { %v1919_v12 = vpop.permute.xlu1 %1918 }
 0x18c   : > { %v2183_v36 = vsel %vm2153_vm10, %v2150_v9, %v1919_v12  ;;  %v1903_v52 = vpop.permute.xlu0 %1902 }
 0x18d   : > { %v2167_v1 = vsel %vm2153_vm10, %v2134_v34, %v1903_v52  ;;  %3430 = vmatprep.mubr.msk.bf16.mxu1 %vm2206_vm11, %v2183_v36 }
 0x18e   : > { %3414 = vmatprep.mubr.msk.bf16.mxu0 %vm2206_vm11, %v2167_v1 }
 0x18f   : > { %v1921_v13 = vpop.permute.xlu1 %1920 }
 0x190   : > { %v2185_v7 = vsel %vm2153_vm10, %v2152_v63, %v1921_v13  ;;  %v1905_v2 = vpop.permute.xlu0 %1904 }
 0x191   : > { %v2169_v55 = vsel %vm2153_vm10, %v2136_v43, %v1905_v2  ;;  %3431 = vmatmul.mubr.msk.bf16.gmra.mrb[12].mxu1 %vm2206_vm11, %v2185_v7 }
 0x192   : > { %3415 = vmatmul.mubr.msk.bf16.gmra.mrb[12].mxu0 %vm2206_vm11, %v2169_v55 }
 0x1a8   : > { %v5010_v48 = vpop.f32.mrb[0].mxu1 }
 0x1a9   : > { %v3404_v23 = vpop.f32.mrb[0].mxu0  ;;  %v3363_v31 = vpack.c.bf16 %v5010_v48, %v5010_v48  ;;  %v5014_v41 = vpop.f32.mrb[1].mxu1 }
 0x1aa   : > { %v3347_v10 = vpack.c.bf16 %v3404_v23, %v3404_v23  ;;  %v2277_v4 = vpop.f32.mrb[1].mxu0  ;;  %v5016_v33 = vpop.f32.mrb[2].mxu1  ;;  %v3361_v18 = vpack.c.bf16 %v5014_v41, %v5014_v41  ;;  %v2475_v37 = vmul.f32 %v3404_v23, %v3404_v23  ;;  %v2407_v0 = vsel %vm2021_vm6, %v3404_v23, 0.0 }
 0x1ab   : > { %2853 = vst.msk [vmem:[%s5008_s7 + $0x48] sm:$0xf] %vm2770_vm12, %v3363_v31  ;;  %v3345_v6 = vpack.c.bf16 %v2277_v4, %v2277_v4  ;;  %v3405_v17 = vpop.f32.mrb[2].mxu0  ;;  %v5020_v22 = vpop.f32.mrb[3].mxu1  ;;  %v2473_v3 = vmul.f32 %v2277_v4, %v2277_v4  ;;  %v3364_v61 = vpack.c.bf16 %v5016_v33, %v5016_v33  ;;  %v2404_v5 = vsel %vm2021_vm6, %v2277_v4, 0.0 }
 0x1ac   : > { %2837 = vst.msk [vmem:[%s5008_s7 + $0x8] sm:$0xf] %vm2770_vm12, %v3347_v10  ;;  %2678 = vrot.lane.b32.xlu0 %v3347_v10, %s3710_s8  ;;  %v2280_v47 = vpop.f32.mrb[3].mxu0  ;;  %v3348_v28 = vpack.c.bf16 %v3405_v17, %v3405_v17  ;;  %2851 = vst.msk [vmem:[%s5008_s7 + $0x40] sm:$0xf] %vm2770_vm12, %v3361_v18  ;;  %v3362_v56 = vpack.c.bf16 %v5020_v22, %v5020_v22  ;;  %v2476_v14 = vmul.f32 %v3405_v17, %v3405_v17 }
 0x1ad   : > { %2835 = vst.msk [vmem:[%s5008_s7] sm:$0xf] %vm2770_vm12, %v3345_v6  ;;  %v2405_v16 = vsel %vm2021_vm6, %v2280_v47, 0.0  ;;  %2854 = vst.msk [vmem:[%s5008_s7 + $0x4c] sm:$0xf] %vm2770_vm12, %v3364_v61  ;;  %v2474_v44 = vmul.f32 %v2280_v47, %v2280_v47  ;;  %v3346_v53 = vpack.c.bf16 %v2280_v47, %v2280_v47  ;;  %v2505_v57 = vsel %vm2021_vm6, %v2473_v3, 0.0 }
 0x1ae   : > { %2838 = vst.msk [vmem:[%s5008_s7 + $0xc] sm:$0xf] %vm2770_vm12, %v3348_v28  ;;  %2680 = vrot.lane.b32.xlu1 %v3348_v28, %s3710_s8  ;;  %v2406_v32 = vadd.f32 %v2405_v16, %v2404_v5  ;;  %2852 = vst.msk [vmem:[%s5008_s7 + $0x44] sm:$0xf] %vm2770_vm12, %v3362_v56  ;;  %v2409_v27 = vsel %vm2021_vm6, %v3405_v17, 0.0  ;;  %v2508_v11 = vsel %vm2021_vm6, %v2475_v37, 0.0 }
 0x1af   : > { %v2506_v24 = vsel %vm2021_vm6, %v2474_v44, 0.0  ;;  %2836 = vst.msk [vmem:[%s5008_s7 + $0x4] sm:$0xf] %vm2770_vm12, %v3346_v53  ;;  %v2510_v51 = vsel %vm2021_vm6, %v2476_v14, 0.0 }
 0x1b0   : > { %2710 = vrot.lane.b32.xlu0 %v3363_v31, %s3710_s8  ;;  %v2408_v60 = vadd.f32 %v2407_v0, %v2406_v32  ;;  %v2507_v54 = vadd.f32 %v2506_v24, %v2505_v57 }
 0x1b2   : > { %2712 = vrot.lane.b32.xlu1 %v3364_v61, %s3710_s8  ;;  %v2410_v19 = vadd.f32 %v2409_v27, %v2408_v60  ;;  %v2509_v40 = vadd.f32 %v2508_v11, %v2507_v54 }
 0x1b4   : > { %2674 = vrot.lane.b32.xlu0 %v3345_v6, %s3710_s8  ;;  %v2511_v21 = vadd.f32 %v2510_v51, %v2509_v40 }
 0x1b6   : > { %2676 = vrot.lane.b32.xlu1 %v3346_v53, %s3710_s8 }
 0x1b8   : > { %2706 = vrot.lane.b32.xlu0 %v3361_v18, %s3710_s8 }
 0x1ba   : > { %2708 = vrot.lane.b32.xlu1 %v3362_v56, %s3710_s8 }
 0x1e8   : > { %v5058_v20 = vpop.f32.mrb[4].mxu1 }
 0x1e9   : > { %v3408_v25 = vpop.f32.mrb[4].mxu0  ;;  %v3367_v46 = vpack.c.bf16 %v5058_v20, %v5058_v20  ;;  %v5062_v39 = vpop.f32.mrb[5].mxu1 }
 0x1ea   : > { %v3351_v15 = vpack.c.bf16 %v3408_v25, %v3408_v25  ;;  %v2293_v45 = vpop.f32.mrb[5].mxu0  ;;  %v5064_v50 = vpop.f32.mrb[6].mxu1  ;;  %v3365_v59 = vpack.c.bf16 %v5062_v39, %v5062_v39  ;;  %v2479_v29 = vmul.f32 %v3408_v25, %v3408_v25  ;;  %v2415_v13 = vsel %vm2021_vm6, %v3408_v25, 0.0 }
 0x1eb   : > { %2857 = vst.msk [vmem:[%s5008_s7 + $0x58] sm:$0xf] %vm2770_vm12, %v3367_v46  ;;  %v2411_v26 = vsel %vm2021_vm6, %v2293_v45, 0.0  ;;  %v2477_v42 = vmul.f32 %v2293_v45, %v2293_v45  ;;  %v3349_v38 = vpack.c.bf16 %v2293_v45, %v2293_v45  ;;  %v3409_v35 = vpop.f32.mrb[6].mxu0  ;;  %v5069_v9 = vpop.f32.mrb[7].mxu1  ;;  %v3368_v8 = vpack.c.bf16 %v5064_v50, %v5064_v50 }
 0x1ec   : > { %2841 = vst.msk [vmem:[%s5008_s7 + $0x18] sm:$0xf] %vm2770_vm12, %v3351_v15  ;;  %v2412_v12 = vadd.f32 %v2411_v26, %v2410_v19  ;;  %2686 = vrot.lane.b32.xlu0 %v3351_v15, %s3710_s8  ;;  %v2296_v30 = vpop.f32.mrb[7].mxu0  ;;  %v3352_v36 = vpack.c.bf16 %v3409_v35, %v3409_v35  ;;  %2855 = vst.msk [vmem:[%s5008_s7 + $0x50] sm:$0xf] %vm2770_vm12, %v3365_v59  ;;  %v3366_v1 = vpack.c.bf16 %v5069_v9, %v5069_v9 }
 0x1ed   : > { %v2512_v34 = vsel %vm2021_vm6, %v2477_v42, 0.0  ;;  %2839 = vst.msk [vmem:[%s5008_s7 + $0x10] sm:$0xf] %vm2770_vm12, %v3349_v38  ;;  %v2413_v62 = vsel %vm2021_vm6, %v2296_v30, 0.0  ;;  %v2478_v49 = vmul.f32 %v2296_v30, %v2296_v30  ;;  %2858 = vst.msk [vmem:[%s5008_s7 + $0x5c] sm:$0xf] %vm2770_vm12, %v3368_v8  ;;  %v3350_v63 = vpack.c.bf16 %v2296_v30, %v2296_v30 }
 0x1ee   : > { %v2513_v52 = vadd.f32 %v2512_v34, %v2511_v21  ;;  %2842 = vst.msk [vmem:[%s5008_s7 + $0x1c] sm:$0xf] %vm2770_vm12, %v3352_v36  ;;  %2688 = vrot.lane.b32.xlu1 %v3352_v36, %s3710_s8  ;;  %v2414_v58 = vadd.f32 %v2413_v62, %v2412_v12  ;;  %v2480_v43 = vmul.f32 %v3409_v35, %v3409_v35  ;;  %2856 = vst.msk [vmem:[%s5008_s7 + $0x54] sm:$0xf] %vm2770_vm12, %v3366_v1 }
 0x1ef   : > { %v2514_v7 = vsel %vm2021_vm6, %v2478_v49, 0.0  ;;  %2840 = vst.msk [vmem:[%s5008_s7 + $0x14] sm:$0xf] %vm2770_vm12, %v3350_v63  ;;  %v2516_v23 = vsel %vm2021_vm6, %v2479_v29, 0.0  ;;  %v2417_v31 = vsel %vm2021_vm6, %v3409_v35, 0.0 }
 0x1f0   : > { %2718 = vrot.lane.b32.xlu0 %v3367_v46, %s3710_s8  ;;  %v2416_v2 = vadd.f32 %v2415_v13, %v2414_v58  ;;  %v2515_v55 = vadd.f32 %v2514_v7, %v2513_v52  ;;  %v2518_v6 = vsel %vm2021_vm6, %v2480_v43, 0.0 }
 0x1f2   : > { %2720 = vrot.lane.b32.xlu1 %v3368_v8, %s3710_s8  ;;  %v2517_v10 = vadd.f32 %v2516_v23, %v2515_v55  ;;  %v2418_v4 = vadd.f32 %v2417_v31, %v2416_v2 }
 0x1f4   : > { %2682 = vrot.lane.b32.xlu0 %v3349_v38, %s3710_s8  ;;  %v2519_v17 = vadd.f32 %v2518_v6, %v2517_v10 }
 0x1f6   : > { %2684 = vrot.lane.b32.xlu1 %v3350_v63, %s3710_s8 }
 0x1f8   : > { %2714 = vrot.lane.b32.xlu0 %v3365_v59, %s3710_s8 }
 0x1fa   : > { %2716 = vrot.lane.b32.xlu1 %v3366_v1, %s3710_s8 }
 0x21e   : > { %v2679_v18 = vpop.permute.xlu0 %2678 }
 0x21f   : > { %2773 = vst.msk [vmem:[%s5111_s11 + $0x8] sm:$0xf] %vm2770_vm12, %v2679_v18 }
 0x220   : > { %v2681_v47 = vpop.permute.xlu1 %2680 }
 0x221   : > { %2774 = vst.msk [vmem:[%s5111_s11 + $0xc] sm:$0xf] %vm2770_vm12, %v2681_v47 }
 0x222   : > { %v2711_v28 = vpop.permute.xlu0 %2710 }
 0x223   : > { %2789 = vst.msk [vmem:[%s5111_s11 + $0x48] sm:$0xf] %vm2770_vm12, %v2711_v28 }
 0x224   : > { %v2713_v3 = vpop.permute.xlu1 %2712 }
 0x225   : > { %2790 = vst.msk [vmem:[%s5111_s11 + $0x4c] sm:$0xf] %vm2770_vm12, %v2713_v3 }
 0x226   : > { %v2675_v61 = vpop.permute.xlu0 %2674 }
 0x227   : > { %2771 = vst.msk [vmem:[%s5111_s11] sm:$0xf] %vm2770_vm12, %v2675_v61 }
 0x228   : > { %v5123_v5 = vpop.f32.mrb[8].mxu1  ;;  %v2677_v56 = vpop.permute.xlu1 %2676 }
 0x229   : > { %v3412_v16 = vpop.f32.mrb[8].mxu0  ;;  %v3371_v37 = vpack.c.bf16 %v5123_v5, %v5123_v5  ;;  %2772 = vst.msk [vmem:[%s5111_s11 + $0x4] sm:$0xf] %vm2770_vm12, %v2677_v56  ;;  %v5129_v53 = vpop.f32.mrb[9].mxu1 }
 0x22a   : > { %v3355_v32 = vpack.c.bf16 %v3412_v16, %v3412_v16  ;;  %v2309_v44 = vpop.f32.mrb[9].mxu0  ;;  %v2707_v60 = vpop.permute.xlu0 %2706  ;;  %v3369_v40 = vpack.c.bf16 %v5129_v53, %v5129_v53  ;;  %v2483_v45 = vmul.f32 %v3412_v16, %v3412_v16  ;;  %v2423_v59 = vsel %vm2021_vm6, %v3412_v16, 0.0 }
 0x22b   : > { %2861 = vst.msk [vmem:[%s5008_s7 + $0x68] sm:$0xf] %vm2770_vm12, %v3371_v37  ;;  %v2419_v0 = vsel %vm2021_vm6, %v2309_v44, 0.0  ;;  %v2481_v57 = vmul.f32 %v2309_v44, %v2309_v44  ;;  %v3353_v14 = vpack.c.bf16 %v2309_v44, %v2309_v44  ;;  %v3413_v24 = vpop.f32.mrb[10].mxu0  ;;  %2787 = vst.msk [vmem:[%s5111_s11 + $0x40] sm:$0xf] %vm2770_vm12, %v2707_v60 }
 0x22c   : > { %2845 = vst.msk [vmem:[%s5008_s7 + $0x28] sm:$0xf] %vm2770_vm12, %v3355_v32  ;;  %v2420_v27 = vadd.f32 %v2419_v0, %v2418_v4  ;;  %v5138_v54 = vpop.f32.mrb[10].mxu1  ;;  %2694 = vrot.lane.b32.xlu0 %v3355_v32, %s3710_s8  ;;  %v2312_v11 = vpop.f32.mrb[11].mxu0  ;;  %v3356_v46 = vpack.c.bf16 %v3413_v24, %v3413_v24  ;;  %2859 = vst.msk [vmem:[%s5008_s7 + $0x60] sm:$0xf] %vm2770_vm12, %v3369_v40  ;;  %v2484_v30 = vmul.f32 %v3413_v24, %v3413_v24 }
 0x22d   : > { %v2520_v19 = vsel %vm2021_vm6, %v2481_v57, 0.0  ;;  %2843 = vst.msk [vmem:[%s5008_s7 + $0x20] sm:$0xf] %vm2770_vm12, %v3353_v14  ;;  %v5146_v51 = vpop.f32.mrb[11].mxu1  ;;  %v2709_v21 = vpop.permute.xlu1 %2708  ;;  %v3372_v15 = vpack.c.bf16 %v5138_v54, %v5138_v54  ;;  %v2421_v42 = vsel %vm2021_vm6, %v2312_v11, 0.0  ;;  %v2482_v38 = vmul.f32 %v2312_v11, %v2312_v11 }
 0x22e   : > { %v2521_v25 = vadd.f32 %v2520_v19, %v2519_v17  ;;  %2788 = vst.msk [vmem:[%s5111_s11 + $0x44] sm:$0xf] %vm2770_vm12, %v2709_v21  ;;  %2846 = vst.msk [vmem:[%s5008_s7 + $0x2c] sm:$0xf] %vm2770_vm12, %v3356_v46  ;;  %v3370_v26 = vpack.c.bf16 %v5146_v51, %v5146_v51  ;;  %2696 = vrot.lane.b32.xlu1 %v3356_v46, %s3710_s8  ;;  %v2422_v35 = vadd.f32 %v2421_v42, %v2420_v27 }
 0x22f   : > { %2862 = vst.msk [vmem:[%s5008_s7 + $0x6c] sm:$0xf] %vm2770_vm12, %v3372_v15  ;;  %v3354_v12 = vpack.c.bf16 %v2312_v11, %v2312_v11  ;;  %v2522_v34 = vsel %vm2021_vm6, %v2482_v38, 0.0  ;;  %v2524_v8 = vsel %vm2021_vm6, %v2483_v45, 0.0  ;;  %v2425_v29 = vsel %vm2021_vm6, %v3413_v24, 0.0 }
 0x230   : > { %2726 = vrot.lane.b32.xlu0 %v3371_v37, %s3710_s8  ;;  %2860 = vst.msk [vmem:[%s5008_s7 + $0x64] sm:$0xf] %vm2770_vm12, %v3370_v26  ;;  %v2424_v36 = vadd.f32 %v2423_v59, %v2422_v35  ;;  %v2523_v52 = vadd.f32 %v2522_v34, %v2521_v25  ;;  %v2526_v49 = vsel %vm2021_vm6, %v2484_v30, 0.0  ;;  %v2489_v38 = vmul.f32 %v5014_v41, %v5014_v41 }
 0x231   : > { %2844 = vst.msk [vmem:[%s5008_s7 + $0x24] sm:$0xf] %vm2770_vm12, %v3354_v12  ;;  %v2435_v34 = vsel %vm2021_vm6, %v5014_v41, 0.0 }
 0x232   : > { %2728 = vrot.lane.b32.xlu1 %v3372_v15, %s3710_s8  ;;  %v2525_v1 = vadd.f32 %v2524_v8, %v2523_v52  ;;  %v2426_v62 = vadd.f32 %v2425_v29, %v2424_v36  ;;  %v2490_v36 = vmul.f32 %v5020_v22, %v5020_v22 }
 0x234   : > { %2690 = vrot.lane.b32.xlu0 %v3353_v14, %s3710_s8  ;;  %v2527_v58 = vadd.f32 %v2526_v49, %v2525_v1  ;;  %v2491_v1 = vmul.f32 %v5010_v48, %v5010_v48  ;;  %v2437_v49 = vsel %vm2021_vm6, %v5020_v22, 0.0  ;;  %v2441_v22 = vsel %vm2021_vm6, %v5016_v33, 0.0 }
 0x236   : > { %2692 = vrot.lane.b32.xlu1 %v3354_v12, %s3710_s8 }
 0x238   : > { %2722 = vrot.lane.b32.xlu0 %v3369_v40, %s3710_s8 }
 0x23a   : > { %2724 = vrot.lane.b32.xlu1 %v3370_v26, %s3710_s8 }
 0x25e   : > { %v2687_v63 = vpop.permute.xlu0 %2686 }
 0x25f   : > { %2777 = vst.msk [vmem:[%s5111_s11 + $0x18] sm:$0xf] %vm2770_vm12, %v2687_v63  ;;  %v2439_v63 = vsel %vm2021_vm6, %v5010_v48, 0.0 }
 0x260   : > { %v2689_v13 = vpop.permute.xlu1 %2688 }
 0x261   : > { %2778 = vst.msk [vmem:[%s5111_s11 + $0x1c] sm:$0xf] %vm2770_vm12, %v2689_v13  ;;  %v2492_v13 = vmul.f32 %v5016_v33, %v5016_v33  ;;  %v2495_v33 = vmul.f32 %v5058_v20, %v5058_v20 }
 0x262   : > { %v2719_v43 = vpop.permute.xlu0 %2718 }
 0x263   : > { %2793 = vst.msk [vmem:[%s5111_s11 + $0x58] sm:$0xf] %vm2770_vm12, %v2719_v43  ;;  %v2538_v43 = vsel %vm2021_vm6, %v2490_v36, 0.0  ;;  %v2542_v48 = vsel %vm2021_vm6, %v2492_v13, 0.0 }
 0x264   : > { %v5183_v7 = vpop.f32.mrb[12].mxu1  ;;  %v2721_v2 = vpop.permute.xlu1 %2720 }
 0x265   : > { %v3416_v55 = vpop.f32.mrb[12].mxu0  ;;  %v5187_v23 = vpack.c.bf16 %v5183_v7, %v5183_v7  ;;  %2794 = vst.msk [vmem:[%s5111_s11 + $0x5c] sm:$0xf] %vm2770_vm12, %v2721_v2  ;;  %v5191_v4 = vpop.f32.mrb[13].mxu1 }
 0x266   : > { %v3359_v31 = vpack.c.bf16 %v3416_v55, %v3416_v55  ;;  %v2325_v10 = vpop.f32.mrb[13].mxu0  ;;  %v2683_v47 = vpop.permute.xlu0 %2682  ;;  %v3373_v37 = vpack.c.bf16 %v5191_v4, %v5191_v4  ;;  %v2487_v24 = vmul.f32 %v3416_v55, %v3416_v55  ;;  %v2431_v46 = vsel %vm2021_vm6, %v3416_v55, 0.0 }
 0x267   : > { %2865 = vst.msk [vmem:[%s5008_s7 + $0x78] sm:$0xf] %vm2770_vm12, %v5187_v23  ;;  %v2427_v6 = vsel %vm2021_vm6, %v2325_v10, 0.0  ;;  %v2485_v17 = vmul.f32 %v2325_v10, %v2325_v10  ;;  %v3357_v18 = vpack.c.bf16 %v2325_v10, %v2325_v10  ;;  %v3417_v28 = vpop.f32.mrb[14].mxu0  ;;  %2775 = vst.msk [vmem:[%s5111_s11 + $0x10] sm:$0xf] %vm2770_vm12, %v2683_v47 }
 0x268   : > { %2849 = vst.msk [vmem:[%s5008_s7 + $0x38] sm:$0xf] %vm2770_vm12, %v3359_v31  ;;  %v2428_v3 = vadd.f32 %v2427_v6, %v2426_v62  ;;  %v5201_v61 = vpop.f32.mrb[14].mxu1  ;;  %2702 = vrot.lane.b32.xlu0 %v3359_v31, %s3710_s8  ;;  %v2328_v56 = vpop.f32.mrb[15].mxu0  ;;  %v3360_v57 = vpack.c.bf16 %v3417_v28, %v3417_v28  ;;  %2863 = vst.msk [vmem:[%s5008_s7 + $0x70] sm:$0xf] %vm2770_vm12, %v3373_v37  ;;  %v2488_v15 = vmul.f32 %v3417_v28, %v3417_v28 }
 0x269   : > { %v2528_v16 = vsel %vm2021_vm6, %v2485_v17, 0.0  ;;  %2847 = vst.msk [vmem:[%s5008_s7 + $0x30] sm:$0xf] %vm2770_vm12, %v3357_v18  ;;  %v5209_v32 = vpop.f32.mrb[15].mxu1  ;;  %v2685_v44 = vpop.permute.xlu1 %2684  ;;  %v3376_v14 = vpack.c.bf16 %v5201_v61, %v5201_v61  ;;  %v2429_v11 = vsel %vm2021_vm6, %v2328_v56, 0.0  ;;  %v2486_v19 = vmul.f32 %v2328_v56, %v2328_v56 }
 0x26a   : > { %v2529_v0 = vadd.f32 %v2528_v16, %v2527_v58  ;;  %2776 = vst.msk [vmem:[%s5111_s11 + $0x14] sm:$0xf] %vm2770_vm12, %v2685_v44  ;;  %v2715_v60 = vpop.permute.xlu0 %2714  ;;  %2850 = vst.msk [vmem:[%s5008_s7 + $0x3c] sm:$0xf] %vm2770_vm12, %v3360_v57  ;;  %v3374_v27 = vpack.c.bf16 %v5209_v32, %v5209_v32  ;;  %2704 = vrot.lane.b32.xlu1 %v3360_v57, %s3710_s8  ;;  %v2430_v40 = vadd.f32 %v2429_v11, %v2428_v3 }
 0x26b   : > { %2791 = vst.msk [vmem:[%s5111_s11 + $0x50] sm:$0xf] %vm2770_vm12, %v2715_v60  ;;  %2866 = vst.msk [vmem:[%s5008_s7 + $0x7c] sm:$0xf] %vm2770_vm12, %v3376_v14  ;;  %v3358_v21 = vpack.c.bf16 %v2328_v56, %v2328_v56  ;;  %v2530_v45 = vsel %vm2021_vm6, %v2486_v19, 0.0  ;;  %v2532_v35 = vsel %vm2021_vm6, %v2487_v24, 0.0 }
 0x26c   : > { %2698 = vrot.lane.b32.xlu0 %v3357_v18, %s3710_s8  ;;  %2864 = vst.msk [vmem:[%s5008_s7 + $0x74] sm:$0xf] %vm2770_vm12, %v3374_v27  ;;  %v2432_v26 = vadd.f32 %v2431_v46, %v2430_v40  ;;  %v2531_v42 = vadd.f32 %v2530_v45, %v2529_v0  ;;  %v2433_v12 = vsel %vm2021_vm6, %v3417_v28, 0.0  ;;  %v2534_v52 = vsel %vm2021_vm6, %v2488_v15, 0.0 }
 0x26d   : > { %v2717_v25 = vpop.permute.xlu1 %2716  ;;  %2848 = vst.msk [vmem:[%s5008_s7 + $0x34] sm:$0xf] %vm2770_vm12, %v3358_v21  ;;  %v2536_v62 = vsel %vm2021_vm6, %v2489_v38, 0.0  ;;  %v2540_v31 = vsel %vm2021_vm6, %v2491_v1, 0.0  ;;  %v2443_v17 = vsel %vm2021_vm6, %v5062_v39, 0.0  ;;  %v2494_v18 = vmul.f32 %v5069_v9, %v5069_v9 }
 0x26e   : > { %2792 = vst.msk [vmem:[%s5111_s11 + $0x54] sm:$0xf] %vm2770_vm12, %v2717_v25  ;;  %2700 = vrot.lane.b32.xlu1 %v3358_v21, %s3710_s8  ;;  %v2434_v59 = vadd.f32 %v2433_v12, %v2432_v26  ;;  %v2533_v30 = vadd.f32 %v2532_v35, %v2531_v42  ;;  %v2445_v56 = vsel %vm2021_vm6, %v5069_v9, 0.0  ;;  %v2447_v44 = vsel %vm2021_vm6, %v5058_v20, 0.0 }
 0x26f   : > { %v2546_v0 = vsel %vm2021_vm6, %v2494_v18, 0.0  ;;  %v2548_v60 = vsel %vm2021_vm6, %v2495_v33, 0.0  ;;  %v2449_v24 = vsel %vm2021_vm6, %v5064_v50, 0.0  ;;  %v2497_v9 = vmul.f32 %v5129_v53, %v5129_v53 }
 0x270   : > { %2730 = vrot.lane.b32.xlu0 %v3373_v37, %s3710_s8  ;;  %v2436_v8 = vadd.f32 %v2435_v34, %v2434_v59  ;;  %v2535_v29 = vadd.f32 %v2534_v52, %v2533_v30  ;;  %v2451_v20 = vsel %vm2021_vm6, %v5129_v53, 0.0  ;;  %v2498_v40 = vmul.f32 %v5146_v51, %v5146_v51 }
 0x271   : > { %v2499_v46 = vmul.f32 %v5123_v5, %v5123_v5  ;;  %v2453_v15 = vsel %vm2021_vm6, %v5146_v51, 0.0  ;;  %v2455_v42 = vsel %vm2021_vm6, %v5123_v5, 0.0  ;;  %v2500_v53 = vmul.f32 %v5138_v54, %v5138_v54 }
 0x272   : > { %2732 = vrot.lane.b32.xlu1 %v3374_v27, %s3710_s8  ;;  %v2438_v41 = vadd.f32 %v2437_v49, %v2436_v8  ;;  %v2537_v58 = vadd.f32 %v2536_v62, %v2535_v29  ;;  %v2554_v38 = vsel %vm2021_vm6, %v2498_v40, 0.0  ;;  %v2457_v30 = vsel %vm2021_vm6, %v5138_v54, 0.0 }
 0x273   : > { %v2556_v59 = vsel %vm2021_vm6, %v2499_v46, 0.0  ;;  %v2501_v51 = vmul.f32 %v5191_v4, %v5191_v4  ;;  %v2558_v52 = vsel %vm2021_vm6, %v2500_v53, 0.0  ;;  %v2459_v5 = vsel %vm2021_vm6, %v5191_v4, 0.0 }
 0x274   : > { %2734 = vrot.lane.b32.xlu0 %v5187_v23, %s3710_s8  ;;  %v2440_v2 = vadd.f32 %v2439_v63, %v2438_v41  ;;  %v2539_v55 = vadd.f32 %v2538_v43, %v2537_v58  ;;  %v2493_v23 = vmul.f32 %v5062_v39, %v5062_v39  ;;  %v2496_v39 = vmul.f32 %v5064_v50, %v5064_v50 }
 0x275   : > { %v2552_v50 = vsel %vm2021_vm6, %v2497_v9, 0.0  ;;  %v2502_v8 = vmul.f32 %v5209_v32, %v5209_v32  ;;  %v2503_v62 = vmul.f32 %v5183_v7, %v5183_v7  ;;  %v2560_v54 = vsel %vm2021_vm6, %v2501_v51, 0.0 }
 0x276   : > { %2736 = vrot.lane.b32.xlu1 %v3376_v14, %s3710_s8  ;;  %v2442_v10 = vadd.f32 %v2441_v22, %v2440_v2  ;;  %v2541_v6 = vadd.f32 %v2540_v31, %v2539_v55  ;;  %v2544_v3 = vsel %vm2021_vm6, %v2493_v23, 0.0  ;;  %v2550_v19 = vsel %vm2021_vm6, %v2496_v39, 0.0 }
 0x277   : > { %v2461_v49 = vsel %vm2021_vm6, %v5209_v32, 0.0  ;;  %v2463_v63 = vsel %vm2021_vm6, %v5183_v7, 0.0  ;;  %v2504_v4 = vmul.f32 %v5201_v61, %v5201_v61  ;;  %v2562_v13 = vsel %vm2021_vm6, %v2502_v8, 0.0 }
 0x278   : > { %v2444_v47 = vadd.f32 %v2443_v17, %v2442_v10  ;;  %v2543_v28 = vadd.f32 %v2542_v48, %v2541_v6  ;;  %v2564_v55 = vsel %vm2021_vm6, %v2503_v62, 0.0  ;;  %v2465_v31 = vsel %vm2021_vm6, %v5201_v61, 0.0 }
 0x279   : > { %v2566_v23 = vsel %vm2021_vm6, %v2504_v4, 0.0 }
 0x27a   : > { %v2446_v16 = vadd.f32 %v2445_v56, %v2444_v47  ;;  %v2545_v37 = vadd.f32 %v2544_v3, %v2543_v28 }
 0x27c   : > { %v2448_v57 = vadd.f32 %v2447_v44, %v2446_v16  ;;  %v2547_v14 = vadd.f32 %v2546_v0, %v2545_v37 }
 0x27e   : > { %v2450_v27 = vadd.f32 %v2449_v24, %v2448_v57  ;;  %v2549_v11 = vadd.f32 %v2548_v60, %v2547_v14 }
 0x280   : > { %v2452_v21 = vadd.f32 %v2451_v20, %v2450_v27  ;;  %v2551_v25 = vadd.f32 %v2550_v19, %v2549_v11 }
 0x282   : > { %v2454_v45 = vadd.f32 %v2453_v15, %v2452_v21  ;;  %v2553_v26 = vadd.f32 %v2552_v50, %v2551_v25 }
 0x284   : > { %v2456_v35 = vadd.f32 %v2455_v42, %v2454_v45  ;;  %v2555_v12 = vadd.f32 %v2554_v38, %v2553_v26 }
 0x286   : > { %v2458_v34 = vadd.f32 %v2457_v30, %v2456_v35  ;;  %v2557_v36 = vadd.f32 %v2556_v59, %v2555_v12 }
 0x288   : > { %v2460_v29 = vadd.f32 %v2459_v5, %v2458_v34  ;;  %v2559_v1 = vadd.f32 %v2558_v52, %v2557_v36 }
 0x28a   : > { %v2462_v41 = vadd.f32 %v2461_v49, %v2460_v29  ;;  %v2561_v58 = vadd.f32 %v2560_v54, %v2559_v1 }
 0x28c   : > { %v2464_v43 = vadd.f32 %v2463_v63, %v2462_v41  ;;  %v2563_v2 = vadd.f32 %v2562_v13, %v2561_v58 }
 0x28e   : > { %v2466_v22 = vadd.f32 %v2465_v31, %v2464_v43  ;;  %v2565_v32 = vadd.f32 %v2564_v55, %v2563_v2 }
 0x290   : > { %v2467_v10 = vrot.slane %v2466_v22, 4  ;;  %v2567_v6 = vadd.f32 %v2566_v23, %v2565_v32 }
 0x292   : > { %v2468_v7 = vadd.f32 %v2467_v10, %v2466_v22  ;;  %v2568_v48 = vrot.slane %v2567_v6, 4 }
 0x294   : > { %v2469_v17 = vrot.slane %v2468_v7, 2  ;;  %v2569_v18 = vadd.f32 %v2568_v48, %v2567_v6 }
 0x296   : > { %v2470_v47 = vadd.f32 %v2469_v17, %v2468_v7  ;;  %v2570_v28 = vrot.slane %v2569_v18, 2 }
 0x298   : > { %v2471_v33 = vrot.slane %v2470_v47, 1  ;;  %v2571_v3 = vadd.f32 %v2570_v28, %v2569_v18 }
 0x29a   : > { %v2572_v56 = vrot.slane %v2571_v3, 1  ;;  %v2472_v16 = vadd.f32 %v2471_v33, %v2470_v47 }
 0x29c   : > { %v2573_v37 = vadd.f32 %v2572_v56, %v2571_v3 }
 0x29e   : > { %v2695_v61 = vpop.permute.xlu0 %2694  ;;  %v2575_v44 = vsel %vm2574_vm13, %v2472_v16, %v2573_v37 }
 0x29f   : > { %2781 = vst.msk [vmem:[%s5111_s11 + $0x28] sm:$0xf] %vm2770_vm12, %v2695_v61 }
 0x2a0   : > { %v2697_v39 = vpop.permute.xlu1 %2696  ;;  %2577 = vst.msk [vmem:[%s205_s14] sm:$0x3] %vm2576_vm14, %v2575_v44 }
 0x2a1   : > { %2782 = vst.msk [vmem:[%s5111_s11 + $0x2c] sm:$0xf] %vm2770_vm12, %v2697_v39 }
 0x2a2   : > { %v2727_v0 = vpop.permute.xlu0 %2726 }
 0x2a3   : > { %2797 = vst.msk [vmem:[%s5111_s11 + $0x68] sm:$0xf] %vm2770_vm12, %v2727_v0 }
 0x2a4   : > { %3651 = shalt.err (!%p3648_p3)
}
 0x2a5   : > { %s3652_s7 = scalar_lea.hbm %s5332_s28, 32  ;;  %s3656_s10 = scalar_lea.hbm %s5408_s4, 64 }
 0x2a6   : > { %p3653_p4 = scmp.ne.s32.totalorder %s5332_s28, %s3652_s7  ;;  %p3657_p9 = scmp.lt.u32.totalorder %s5332_s28, %s5408_s4 }
 0x2a7   : > { %p3658_p10 = scmp.lt.u32.totalorder %s3656_s10, %s3652_s7  ;;  %p3660_p12 = scmp.lt.u32.totalorder %s3652_s7, %s5332_s28 }
 0x2a8   : > { %p3654_p7 = pnand %p3653_p4, %p3775_p5 }
 0x2a9   : > { %p3659_p11 = por %p3658_p10, %p3657_p9 }
 0x2aa   : > { %p3655_p8 = pneg %p3654_p7 }
 0x2ab   : > { %p3661_p13 = por %p3660_p12, %p3659_p11 }
 0x2ad   : > { %p3662_p0 = pnand %p3661_p13, %p3655_p8 }
 0x2af   : > { %3665 = shalt.err (!%p3662_p0)
}
 0x2b0   : > { %3443 = dma.vmem_to_hbm [thread:$0]  (%p3775_p5), %s5334_s20, 32, %s5332_s28, %s2878_s19   ;;  %v2729_v57 = vpop.permute.xlu1 %2728  ;;  %v2691_v14 = vpop.permute.xlu0 %2690 }
 0x2b1   : > { %2798 = vst.msk [vmem:[%s5111_s11 + $0x6c] sm:$0xf] %vm2770_vm12, %v2729_v57  ;;  %2779 = vst.msk [vmem:[%s5111_s11 + $0x20] sm:$0xf] %vm2770_vm12, %v2691_v14 }
 0x2b4   : > { %v2693_v60 = vpop.permute.xlu1 %2692  ;;  %v2723_v24 = vpop.permute.xlu0 %2722 }
 0x2b5   : > { %2780 = vst.msk [vmem:[%s5111_s11 + $0x24] sm:$0xf] %vm2770_vm12, %v2693_v60  ;;  %2795 = vst.msk [vmem:[%s5111_s11 + $0x60] sm:$0xf] %vm2770_vm12, %v2723_v24 }
 0x2b8   : > { %v2725_v9 = vpop.permute.xlu1 %2724 }
 0x2b9   : > { %2796 = vst.msk [vmem:[%s5111_s11 + $0x64] sm:$0xf] %vm2770_vm12, %v2725_v9 }
 0x2da   : > { %v2703_v27 = vpop.permute.xlu0 %2702 }
 0x2db   : > { %2785 = vst.msk [vmem:[%s5111_s11 + $0x38] sm:$0xf] %vm2770_vm12, %v2703_v27 }
 0x2dc   : > { %v2705_v11 = vpop.permute.xlu1 %2704 }
 0x2dd   : > { %2786 = vst.msk [vmem:[%s5111_s11 + $0x3c] sm:$0xf] %vm2770_vm12, %v2705_v11 }
 0x2de   : > { %v2699_v19 = vpop.permute.xlu0 %2698 }
 0x2df   : > { %2783 = vst.msk [vmem:[%s5111_s11 + $0x30] sm:$0xf] %vm2770_vm12, %v2699_v19 }
 0x2e0   : > { %v2701_v20 = vpop.permute.xlu1 %2700 }
 0x2e1   : > { %2784 = vst.msk [vmem:[%s5111_s11 + $0x34] sm:$0xf] %vm2770_vm12, %v2701_v20 }
 0x2e2   : > { %v2731_v40 = vpop.permute.xlu0 %2730 }
 0x2e3   : > { %2799 = vst.msk [vmem:[%s5111_s11 + $0x70] sm:$0xf] %vm2770_vm12, %v2731_v40 }
 0x2e4   : > { %v2733_v21 = vpop.permute.xlu1 %2732 }
 0x2e5   : > { %2800 = vst.msk [vmem:[%s5111_s11 + $0x74] sm:$0xf] %vm2770_vm12, %v2733_v21 }
 0x2e6   : > { %v2735_v25 = vpop.permute.xlu0 %2734 }
 0x2e7   : > { %2801 = vst.msk [vmem:[%s5111_s11 + $0x78] sm:$0xf] %vm2770_vm12, %v2735_v25 }
 0x2e8   : > { %v2737_v46 = vpop.permute.xlu1 %2736 }
 0x2e9   : > { %2802 = vst.msk [vmem:[%s5111_s11 + $0x7c] sm:$0xf] %vm2770_vm12, %v2737_v46 }
 0x2ea PF: > { %p3449_p5 = scmp.ge.s32.totalorder %s3700_s18, 2  ;;  %s2925_s25 = sand.u32 1, %s3688_s15  }
 0x2eb   : > { %s2926_s13 = scalar_lea.sflag [#allocation3], %s2925_s25 }
 0x2ec   : > { %p3446_p1 = pnand %p3449_p5, %p3779_p6 }
 0x2ee   : > { %3683 = dma.done.wait (!%p3446_p1), %s2926_s13, 32  }
 0x2ef   : > { %3685 = vsyncadd (!%p3446_p1), %s2926_s13, 4294967264  ;;  %p15_p2 = scmp.ge.s32.totalorder %s3762_s21, 4   ;;  %s5423_s15 = smov %s3692_s16 }
 0x2f0   : > { %s5424_s16 = smov %s3696_s17  ;;  %s5425_s17 = smov %s3773_s24 }
 0x2f1   : > { %s5426_s18 = smov %s3762_s21  ;;  %17 = sbr.rel (!%p15_p2) target bundleno = 3 (0x3), region = 89 }
 0x2f8   :  { %2931 = vsyncpa [#allocation3], 1 }
 0x2f9   :  { %2933 = vsyncpa [#allocation3 + $0x1], 1 }

</bundles_post_ra>
